<compile_context>
chip_gen: v6e
topology: v6e:2x2x1
jax: 0.10.0
libtpu: 0.0.40
codegen_flags: <defaults>
</compile_context>

<pallas_src>
import functools
import math

import jax
import jax.numpy as jnp
from jax import lax
from jax.experimental import pallas as pl
from jax.experimental.pallas import tpu as pltpu

_SUBLANE = {1: 32, 2: 16, 4: 8}      # dtype itemsize -> sublane packing quantum
_BLOCK_BYTES = 4 * 1024 * 1024       # target bytes of input per grid step
_BM_MAX = 512                        # max sublane rows per block (trailing kernel)
_LANE_MAX = 4096                     # max lanes per block (leading kernel)
_BN_ABS = 32768                      # absolute cap on lane extent (bounds fold unroll)
_ROWS_ABS = 2048                     # absolute cap on row extent (leading kernel)
_PALLAS_MIN_BYTES = 256 * 1024       # below this, plain XLA reduction is faster


def _round_up(a, b):
    return -(-a // b) * b


def _identity_for(dtype):
    """Identity element for `min` in the given dtype."""
    dtype = jnp.dtype(dtype)
    if jnp.issubdtype(dtype, jnp.floating):
        return float("inf")
    if jnp.issubdtype(dtype, jnp.integer):
        return int(jnp.iinfo(dtype).max)
    raise NotImplementedError(f"amin: unsupported dtype {dtype}")


# --------------------------------------------------------------------------------------
# Trailing-axis reduction: x2d is (M, N), min over the last axis.
# Grid = (split, row_blocks, reduction_blocks); reduction innermost.
# --------------------------------------------------------------------------------------
def _amin_trailing_kernel(x_ref, o_ref, acc_ref, *, n_valid, bn, nbs, identity):
    s = pl.program_id(0)
    j = pl.program_id(2)

    @pl.when(j == 0)
    def _init():
        acc_ref[...] = jnp.full(acc_ref.shape, identity, acc_ref.dtype)

    x = x_ref[...]
    ident = jnp.asarray(identity, x.dtype)

    def fold(v):
        # Pure-VPU fold of bn lanes down to a 128-lane running minimum (vreg-aligned
        # slices, no cross-lane traffic).
        m = v[:, 0:128]
        for c in range(1, bn // 128):
            m = jnp.minimum(m, v[:, c * 128:(c + 1) * 128])
        return m

    if n_valid % bn != 0:
        start = (s * nbs + j) * bn     # global lane offset of this block

        @pl.when(start + bn > n_valid)  # only the ragged last reduction block
        def _masked():
            lane = lax.broadcasted_iota(jnp.int32, x.shape, 1)
            xm = jnp.where(start + lane < n_valid, x, ident)
            acc_ref[...] = jnp.minimum(acc_ref[...], fold(xm))

        @pl.when(start + bn <= n_valid)
        def _plain():
            acc_ref[...] = jnp.minimum(acc_ref[...], fold(x))
    else:
        acc_ref[...] = jnp.minimum(acc_ref[...], fold(x))

    # Single cross-lane (XLU) reduce + store per output block.
    @pl.when(j == pl.num_programs(2) - 1)
    def _finalize():
        o_ref[...] = jnp.min(acc_ref[...], axis=-1, keepdims=True)


def _amin_trailing(x2d):
    M, N = x2d.shape
    dtype = jnp.dtype(x2d.dtype)
    item = dtype.itemsize
    sub = _SUBLANE.get(item, 8)
    identity = _identity_for(dtype)

    bm = min(_BM_MAX, _round_up(M, sub))
    bn_cap = max(128, (_BLOCK_BYTES // (bm * item)) // 128 * 128)
    bn = min(_BN_ABS, bn_cap, _round_up(N, 128))
    m_blocks = pl.cdiv(M, bm)
    n_blocks = pl.cdiv(N, bn)

    # v7x has 2 TensorCores: when the row axis alone cannot feed both, split the
    # reduction range into two partial minima (combined with a tiny jnp.min below).
    # TODO(synk): generalize the split to odd n_blocks (needs a clamped index_map).
    n_split = 2 if (m_blocks == 1 and n_blocks >= 4 and n_blocks % 2 == 0) else 1
    nbs = n_blocks // n_split

    acc_bytes = bm * 128 * item
    vmem_limit = int(min(100 * 2**20, 2 * bm * bn * item + acc_bytes + 8 * 2**20))

    out = pl.pallas_call(
        functools.partial(_amin_trailing_kernel, n_valid=N, bn=bn, nbs=nbs,
                          identity=identity),
        out_shape=jax.ShapeDtypeStruct((n_split, m_blocks * bm, 1), dtype),
        grid_spec=pltpu.PrefetchScalarGridSpec(
            num_scalar_prefetch=0,
            grid=(n_split, m_blocks, nbs),
            in_specs=[pl.BlockSpec((bm, bn), lambda s, i, j: (i, s * nbs + j))],
            out_specs=pl.BlockSpec((None, bm, 1), lambda s, i, j: (s, i, 0)),
            scratch_shapes=[pltpu.VMEM((bm, 128), dtype)],
        ),
        compiler_params=pltpu.CompilerParams(
            dimension_semantics=("parallel", "parallel", "arbitrary"),
            vmem_limit_bytes=vmem_limit,
        ),
    )(x2d)
    # Combine the split partial minima and drop the padded row tail.
    return jnp.min(out, axis=0)[:M, 0]


# --------------------------------------------------------------------------------------
# Leading-axis reduction: x2d is (N, M), min over the first axis (no transpose needed).
# Grid = (lane_blocks, reduction_blocks); reduction innermost.  Lane-dense output.
# --------------------------------------------------------------------------------------
def _amin_leading_kernel(x_ref, o_ref, acc_ref, *, n_valid, bn_rows, sub, identity):
    j = pl.program_id(1)

    @pl.when(j == 0)
    def _init():
        acc_ref[...] = jnp.full(acc_ref.shape, identity, acc_ref.dtype)

    x = x_ref[...]
    ident = jnp.asarray(identity, x.dtype)

    def fold(v):
        # Pure-VPU fold of bn_rows sublanes down to one sublane-quantum of rows.
        m = v[0:sub, :]
        for r in range(1, bn_rows // sub):
            m = jnp.minimum(m, v[r * sub:(r + 1) * sub, :])
        return m

    if n_valid % bn_rows != 0:
        start = j * bn_rows

        @pl.when(start + bn_rows > n_valid)  # only the ragged last reduction block
        def _masked():
            row = lax.broadcasted_iota(jnp.int32, x.shape, 0)
            xm = jnp.where(start + row < n_valid, x, ident)
            acc_ref[...] = jnp.minimum(acc_ref[...], fold(xm))

        @pl.when(start + bn_rows <= n_valid)
        def _plain():
            acc_ref[...] = jnp.minimum(acc_ref[...], fold(x))
    else:
        acc_ref[...] = jnp.minimum(acc_ref[...], fold(x))

    # Single cross-sublane reduce + lane-dense store per lane block.
    @pl.when(j == pl.num_programs(1) - 1)
    def _finalize():
        o_ref[...] = jnp.min(acc_ref[...], axis=0, keepdims=True)


def _amin_leading(x2d):
    N, M = x2d.shape
    dtype = jnp.dtype(x2d.dtype)
    item = dtype.itemsize
    sub = _SUBLANE.get(item, 8)
    identity = _identity_for(dtype)

    bl = min(_LANE_MAX, _round_up(M, 128))
    rows_cap = max(sub, (_BLOCK_BYTES // (bl * item)) // sub * sub)
    bn_rows = min(_ROWS_ABS, rows_cap, _round_up(N, sub))
    lane_blocks = pl.cdiv(M, bl)
    row_blocks = pl.cdiv(N, bn_rows)

    acc_bytes = sub * bl * item
    vmem_limit = int(min(100 * 2**20, 2 * bn_rows * bl * item + acc_bytes + 8 * 2**20))

    out = pl.pallas_call(
        functools.partial(_amin_leading_kernel, n_valid=N, bn_rows=bn_rows, sub=sub,
                          identity=identity),
        out_shape=jax.ShapeDtypeStruct((1, lane_blocks * bl), dtype),
        grid_spec=pltpu.PrefetchScalarGridSpec(
            num_scalar_prefetch=0,
            grid=(lane_blocks, row_blocks),
            in_specs=[pl.BlockSpec((bn_rows, bl), lambda i, j: (j, i))],
            out_specs=pl.BlockSpec((1, bl), lambda i, j: (0, i)),
            scratch_shapes=[pltpu.VMEM((sub, bl), dtype)],
        ),
        compiler_params=pltpu.CompilerParams(
            dimension_semantics=("parallel", "arbitrary"),
            vmem_limit_bytes=vmem_limit,
        ),
    )(x2d)
    return out[0, :M]


# --------------------------------------------------------------------------------------
# Public wrapper: JAX/Pallas equivalent of torch.amin(x, dim, keep_dims).
# --------------------------------------------------------------------------------------
def amin(x, dim, keep_dims=False):
    ndim = x.ndim
    dims = (dim,) if isinstance(dim, int) else tuple(dim)
    dims = tuple(sorted(d % ndim for d in dims))
    kept = tuple(d for d in range(ndim) if d not in dims)
    kept_shape = tuple(x.shape[d] for d in kept)

    dtype = jnp.dtype(x.dtype)
    supported = jnp.issubdtype(dtype, jnp.floating) or jnp.issubdtype(dtype, jnp.integer)

    # Tiny problems / unsupported dtypes (e.g. bool): plain XLA reduction is faster than
    # the fixed pallas_call overhead and always correct.
    if (not supported) or x.size * dtype.itemsize < _PALLAS_MIN_BYTES:
        return jnp.min(x, axis=dims, keepdims=keep_dims)

    M = math.prod(kept_shape) if kept_shape else 1
    N = math.prod(x.shape[d] for d in dims) if dims else 1

    if kept + dims == tuple(range(ndim)):
        # Reduced dims already trailing/contiguous: pure view reshape, trailing kernel.
        res = _amin_trailing(x.reshape(M, N))
    elif dims == tuple(range(len(dims))):
        # Reduced dims leading/contiguous: pure view reshape, leading-axis kernel.
        # Avoids the HBM round-trip of a transpose entirely.
        res = _amin_leading(x.reshape(N, M))
    else:
        # Scattered reduced dims: fall back to transpose + trailing kernel.
        res = _amin_trailing(jnp.transpose(x, kept + dims).reshape(M, N))

    res = res.reshape(kept_shape)
    if keep_dims:
        res = res.reshape(tuple(1 if d in dims else x.shape[d] for d in range(ndim)))
    return res


if __name__ == "__main__":
    key = jax.random.PRNGKey(0)

    cases = [
        # (shape, dim, keep_dims, dtype) — module test_data shapes (tiny -> XLA fallback)
        ((2, 4, 16, 16), (0, 3), True, jnp.float32),
        ((10,), 0, False, jnp.float32),
        ((2, 2), (1,), True, jnp.float32),
        ((1, 2, 5, 5), (0, 1, 2, 3), False, jnp.float32),
        ((1, 2, 2, 2), (0, 3), True, jnp.float32),
        ((2, 2, 2, 2), 0, True, jnp.float32),
        # larger shapes that exercise the Pallas kernels
        ((256, 8, 384), (1, 2), False, jnp.float32),    # trailing kernel, single block
        ((96, 5000), 1, True, jnp.float32),             # trailing kernel, ragged lane tail
        ((64, 256, 192), (0, 2), False, jnp.float32),   # transpose + trailing, 3 red. steps
        ((64, 65536), 1, False, jnp.float32),           # trailing, dual-TC split partials
        ((12, 128, 256), (0, 1), False, jnp.float32),   # leading-axis kernel, no transpose
        ((5000, 256), 0, True, jnp.float32),            # leading kernel, ragged row tail
        ((128, 8, 512), (1, 2), False, jnp.bfloat16),   # bf16 trailing
        ((256, 2048), (1,), False, jnp.int32),          # int32 trailing
    ]

    ok = True
    for shape, dim, keep, dtype in cases:
        key, sk = jax.random.split(key)
        if jnp.issubdtype(jnp.dtype(dtype), jnp.integer):
            x = jax.random.randint(sk, shape, -1000, 1000, dtype=jnp.int32).astype(dtype)
        else:
            x = jax.random.uniform(sk, shape, dtype=jnp.float32).astype(dtype)

        got = jax.block_until_ready(amin(x, dim, keep))
        axes = (dim,) if isinstance(dim, int) else tuple(dim)
        ref = jnp.min(x, axis=axes, keepdims=keep)
        if got.shape != ref.shape or not bool(jnp.all(got == ref)):
            ok = False
            print("MISMATCH", shape, dim, keep, str(dtype), got.shape, ref.shape)

    if ok:
        print("KERNEL_OK")
</pallas_src>

<mosaic_0001>
module attributes {stable_mosaic.version = 11 : i64} {
  func.func @_amin_trailing_kernel(%arg0: i32, %arg1: i32, %arg2: i32, %arg3: memref<256x3072xf32, #tpu.memory_space<vmem>>, %arg4: memref<1x256x1xf32, #tpu.memory_space<vmem>>, %arg5: memref<256x128xf32, #tpu.memory_space<vmem>>) attributes {dimension_semantics = [#tpu.dimension_semantics<parallel>, #tpu.dimension_semantics<parallel>, #tpu.dimension_semantics<arbitrary>], iteration_bounds = array<i64: 1, 1, 1>, scalar_prefetch = 0 : i64, scratch_operands = 1 : i64, tpu.core_type = #tpu.core_type<tc>, window_params = [{transform_indices = @transform_0, window_bounds = array<i64: 256, 3072>}, {transform_indices = @transform_1, window_bounds = array<i64: 1, 256, 1>}]} {
    %c0_i32 = arith.constant 0 : i32
    %0 = arith.cmpi eq, %arg2, %c0_i32 : i32
    %1 = arith.extui %0 : i1 to i32
    %c0_i32_0 = arith.constant 0 : i32
    %2 = arith.cmpi ne, %1, %c0_i32_0 : i32
    scf.if %2 {
      %cst = arith.constant 0x7F800000 : f32
      %57 = vector.broadcast %cst : f32 to vector<256x128xf32>
      %c0_8 = arith.constant 0 : index
      %c0_9 = arith.constant 0 : index
      %58 = vector.load %arg5[%c0_8, %c0_9] : memref<256x128xf32, #tpu.memory_space<vmem>>, vector<256x128xf32>
      tpu.vector_store %arg5[%c0_8, %c0_9], %57 {strides = array<i32>} : memref<256x128xf32, #tpu.memory_space<vmem>>, vector<256x128xf32>,
    } else {
    }
    %c0 = arith.constant 0 : index
    %c0_1 = arith.constant 0 : index
    %3 = vector.load %arg3[%c0, %c0_1] : memref<256x3072xf32, #tpu.memory_space<vmem>>, vector<256x3072xf32>
    %c0_2 = arith.constant 0 : index
    %c0_3 = arith.constant 0 : index
    %4 = vector.load %arg5[%c0_2, %c0_3] : memref<256x128xf32, #tpu.memory_space<vmem>>, vector<256x128xf32>
    %5 = vector.extract_strided_slice %3 {offsets = [0, 0], sizes = [256, 128], strides = [1, 1]} : vector<256x3072xf32> to vector<256x128xf32>
    %6 = vector.extract_strided_slice %3 {offsets = [0, 128], sizes = [256, 128], strides = [1, 1]} : vector<256x3072xf32> to vector<256x128xf32>
    %7 = arith.minimumf %5, %6 : vector<256x128xf32>
    %8 = vector.extract_strided_slice %3 {offsets = [0, 256], sizes = [256, 128], strides = [1, 1]} : vector<256x3072xf32> to vector<256x128xf32>
    %9 = arith.minimumf %7, %8 : vector<256x128xf32>
    %10 = vector.extract_strided_slice %3 {offsets = [0, 384], sizes = [256, 128], strides = [1, 1]} : vector<256x3072xf32> to vector<256x128xf32>
    %11 = arith.minimumf %9, %10 : vector<256x128xf32>
    %12 = vector.extract_strided_slice %3 {offsets = [0, 512], sizes = [256, 128], strides = [1, 1]} : vector<256x3072xf32> to vector<256x128xf32>
    %13 = arith.minimumf %11, %12 : vector<256x128xf32>
    %14 = vector.extract_strided_slice %3 {offsets = [0, 640], sizes = [256, 128], strides = [1, 1]} : vector<256x3072xf32> to vector<256x128xf32>
    %15 = arith.minimumf %13, %14 : vector<256x128xf32>
    %16 = vector.extract_strided_slice %3 {offsets = [0, 768], sizes = [256, 128], strides = [1, 1]} : vector<256x3072xf32> to vector<256x128xf32>
    %17 = arith.minimumf %15, %16 : vector<256x128xf32>
    %18 = vector.extract_strided_slice %3 {offsets = [0, 896], sizes = [256, 128], strides = [1, 1]} : vector<256x3072xf32> to vector<256x128xf32>
    %19 = arith.minimumf %17, %18 : vector<256x128xf32>
    %20 = vector.extract_strided_slice %3 {offsets = [0, 1024], sizes = [256, 128], strides = [1, 1]} : vector<256x3072xf32> to vector<256x128xf32>
    %21 = arith.minimumf %19, %20 : vector<256x128xf32>
    %22 = vector.extract_strided_slice %3 {offsets = [0, 1152], sizes = [256, 128], strides = [1, 1]} : vector<256x3072xf32> to vector<256x128xf32>
    %23 = arith.minimumf %21, %22 : vector<256x128xf32>
    %24 = vector.extract_strided_slice %3 {offsets = [0, 1280], sizes = [256, 128], strides = [1, 1]} : vector<256x3072xf32> to vector<256x128xf32>
    %25 = arith.minimumf %23, %24 : vector<256x128xf32>
    %26 = vector.extract_strided_slice %3 {offsets = [0, 1408], sizes = [256, 128], strides = [1, 1]} : vector<256x3072xf32> to vector<256x128xf32>
    %27 = arith.minimumf %25, %26 : vector<256x128xf32>
    %28 = vector.extract_strided_slice %3 {offsets = [0, 1536], sizes = [256, 128], strides = [1, 1]} : vector<256x3072xf32> to vector<256x128xf32>
    %29 = arith.minimumf %27, %28 : vector<256x128xf32>
    %30 = vector.extract_strided_slice %3 {offsets = [0, 1664], sizes = [256, 128], strides = [1, 1]} : vector<256x3072xf32> to vector<256x128xf32>
    %31 = arith.minimumf %29, %30 : vector<256x128xf32>
    %32 = vector.extract_strided_slice %3 {offsets = [0, 1792], sizes = [256, 128], strides = [1, 1]} : vector<256x3072xf32> to vector<256x128xf32>
    %33 = arith.minimumf %31, %32 : vector<256x128xf32>
    %34 = vector.extract_strided_slice %3 {offsets = [0, 1920], sizes = [256, 128], strides = [1, 1]} : vector<256x3072xf32> to vector<256x128xf32>
    %35 = arith.minimumf %33, %34 : vector<256x128xf32>
    %36 = vector.extract_strided_slice %3 {offsets = [0, 2048], sizes = [256, 128], strides = [1, 1]} : vector<256x3072xf32> to vector<256x128xf32>
    %37 = arith.minimumf %35, %36 : vector<256x128xf32>
    %38 = vector.extract_strided_slice %3 {offsets = [0, 2176], sizes = [256, 128], strides = [1, 1]} : vector<256x3072xf32> to vector<256x128xf32>
    %39 = arith.minimumf %37, %38 : vector<256x128xf32>
    %40 = vector.extract_strided_slice %3 {offsets = [0, 2304], sizes = [256, 128], strides = [1, 1]} : vector<256x3072xf32> to vector<256x128xf32>
    %41 = arith.minimumf %39, %40 : vector<256x128xf32>
    %42 = vector.extract_strided_slice %3 {offsets = [0, 2432], sizes = [256, 128], strides = [1, 1]} : vector<256x3072xf32> to vector<256x128xf32>
    %43 = arith.minimumf %41, %42 : vector<256x128xf32>
    %44 = vector.extract_strided_slice %3 {offsets = [0, 2560], sizes = [256, 128], strides = [1, 1]} : vector<256x3072xf32> to vector<256x128xf32>
    %45 = arith.minimumf %43, %44 : vector<256x128xf32>
    %46 = vector.extract_strided_slice %3 {offsets = [0, 2688], sizes = [256, 128], strides = [1, 1]} : vector<256x3072xf32> to vector<256x128xf32>
    %47 = arith.minimumf %45, %46 : vector<256x128xf32>
    %48 = vector.extract_strided_slice %3 {offsets = [0, 2816], sizes = [256, 128], strides = [1, 1]} : vector<256x3072xf32> to vector<256x128xf32>
    %49 = arith.minimumf %47, %48 : vector<256x128xf32>
    %50 = vector.extract_strided_slice %3 {offsets = [0, 2944], sizes = [256, 128], strides = [1, 1]} : vector<256x3072xf32> to vector<256x128xf32>
    %51 = arith.minimumf %49, %50 : vector<256x128xf32>
    %52 = arith.minimumf %4, %51 : vector<256x128xf32>
    %c0_4 = arith.constant 0 : index
    %c0_5 = arith.constant 0 : index
    %53 = vector.load %arg5[%c0_4, %c0_5] : memref<256x128xf32, #tpu.memory_space<vmem>>, vector<256x128xf32>
    tpu.vector_store %arg5[%c0_4, %c0_5], %52 {strides = array<i32>} : memref<256x128xf32, #tpu.memory_space<vmem>>, vector<256x128xf32>,
    %c0_i32_6 = arith.constant 0 : i32
    %54 = arith.cmpi eq, %arg2, %c0_i32_6 : i32
    %55 = arith.extui %54 : i1 to i32
    %c0_i32_7 = arith.constant 0 : i32
    %56 = arith.cmpi ne, %55, %c0_i32_7 : i32
    scf.if %56 {
      %c0_8 = arith.constant 0 : index
      %c0_9 = arith.constant 0 : index
      %57 = vector.load %arg5[%c0_8, %c0_9] : memref<256x128xf32, #tpu.memory_space<vmem>>, vector<256x128xf32>
      %cst = arith.constant dense<0x7F800000> : vector<256xf32>
      %58 = vector.multi_reduction <minimumf>, %57, %cst [1] : vector<256x128xf32> to vector<256xf32>
      %59 = vector.shape_cast %58 : vector<256xf32> to vector<256x1xf32>
      %c0_10 = arith.constant 0 : index
      %c0_11 = arith.constant 0 : index
      %c0_12 = arith.constant 0 : index
      %60 = vector.load %arg4[%c0_10, %c0_11, %c0_12] : memref<1x256x1xf32, #tpu.memory_space<vmem>>, vector<1x256x1xf32>
      %61 = vector.shape_cast %60 : vector<1x256x1xf32> to vector<256x1xf32>
      %62 = vector.shape_cast %59 : vector<256x1xf32> to vector<1x256x1xf32>
      tpu.vector_store %arg4[%c0_10, %c0_11, %c0_12], %62 {strides = array<i32>} : memref<1x256x1xf32, #tpu.memory_space<vmem>>, vector<1x256x1xf32>,
    } else {
    }
    return
  }
  func.func @transform_0(%arg0: i32, %arg1: i32, %arg2: i32) -> (i32, i32) {
    %c1_i32 = arith.constant 1 : i32
    %0 = arith.muli %arg0, %c1_i32 : i32
    %1 = arith.addi %0, %arg2 : i32
    %c0_i32 = arith.constant 0 : i32
    return %arg1, %1 : i32, i32
  }
  func.func @transform_1(%arg0: i32, %arg1: i32, %arg2: i32) -> (i32, i32, i32) {
    %c0_i32 = arith.constant 0 : i32
    %c0_i32_0 = arith.constant 0 : i32
    return %arg0, %arg1, %c0_i32 : i32, i32, i32
  }
}

</mosaic_0001>

<bundles_post_ra>
// kernel: tpu_custom_call.1
= control target key start
LH: loop header
LB: loop body
LE: loop exit
PB: predicated region body
PF: predicated region fallthrough
CT: control target
= control target key end

     0   :  { %6 = vsyncpa [#allocation4], 0  ;;  %s1826_s6 = smov [#allocation3]   ;;  %s1970_s0 = inlined_call_operand.hbm [shape: f32[256,3072], index: 0, kind: input, shape index: {}]   ;;  %s1971_s1 = inlined_call_operand.vmem [shape: f32[1,256,1], index: 1, kind: output, shape index: {}]  }
   0x1   :  { %s16_s7 = sshll.u32 %s1826_s6, 4  ;;  %s17_s7 = int_to_ptr.vmem [resolvable:$true] %s16_s7 }
   0x2   :  { %s1812_s8 = scalar_lea.vmem %s17_s7, 98304  ;;  %p1817_p1 = scmp.lt.s32.totalorder %s17_s7, %s17_s7 }
   0x3   :  { %p1813_p0 = scmp.ne.s32.totalorder %s17_s7, %s1812_s8  ;;  %p1818_p2 = scmp.lt.s32.totalorder %s1812_s8, %s1812_s8 }
   0x5   :  { %p1819_p3 = por %p1818_p2, %p1817_p1 }
   0x7   :  { %p1820_p4 = pnand %p1819_p3, %p1813_p0 }
   0x9   :  { %1823 = shalt.err (!%p1820_p4)
}
   0xa   :  { %s1827_s9 = smov 3072   ;;  %s1828_s10 = smov 192  }
   0xb   :  { %22 = dma.hbm_to_vmem [thread:$0]  %s1970_s0, 98304, %s17_s7, [#allocation4], %s1827_s9, %s1827_s9, %s1828_s10  }
   0xc   :  { %1824 = dma.done.wait [#allocation4], 98304  }
   0xd   :  { %1825 = vsyncadd [#allocation4], 4294868992  ;;  %v112_v0 = vld [vmem:[#allocation3 + $0x180] sm:$0xff]  ;;  %v113_v1 = vld [vmem:[#allocation3 + $0x188] sm:$0xff]  ;;  %vm1763_vm0 = vcmask 7168  }
   0xe   :  { %v114_v2 = vld [vmem:[#allocation3 + $0x190] sm:$0xff]  ;;  %v866_v3 = vmin.f32 %v112_v0, %v113_v1  ;;  %v115_v4 = vld [vmem:[#allocation3 + $0x198] sm:$0xff]  ;;  %v116_v6 = vld [vmem:[#allocation3 + $0x1a0] sm:$0xff] }
   0xf   :  { %v117_v8 = vld [vmem:[#allocation3 + $0x1a8] sm:$0xff]  ;;  %v118_v9 = vld [vmem:[#allocation3 + $0x1b0] sm:$0xff]  ;;  %v64_v11 = vld [vmem:[#allocation3] sm:$0xff] }
  0x10   :  { %v898_v5 = vmin.f32 %v866_v3, %v114_v2  ;;  %v65_v12 = vld [vmem:[#allocation3 + $0x8] sm:$0xff]  ;;  %v66_v13 = vld [vmem:[#allocation3 + $0x10] sm:$0xff]  ;;  %v119_v16 = vld [vmem:[#allocation3 + $0x1b8] sm:$0xff] }
  0x11   :  { %v864_v15 = vmin.f32 %v64_v11, %v65_v12  ;;  %v67_v17 = vld [vmem:[#allocation3 + $0x18] sm:$0xff]  ;;  %v120_v20 = vld [vmem:[#allocation3 + $0x1c0] sm:$0xff]  ;;  %v121_v24 = vld [vmem:[#allocation3 + $0x1c8] sm:$0xff] }
  0x12   :  { %v930_v7 = vmin.f32 %v898_v5, %v115_v4  ;;  %v68_v21 = vld [vmem:[#allocation3 + $0x20] sm:$0xff]  ;;  %v69_v25 = vld [vmem:[#allocation3 + $0x28] sm:$0xff]  ;;  %v122_v26 = vld [vmem:[#allocation3 + $0x1d0] sm:$0xff] }
  0x13   :  { %v896_v19 = vmin.f32 %v864_v15, %v66_v13  ;;  %v70_v28 = vld [vmem:[#allocation3 + $0x30] sm:$0xff]  ;;  %v136_v30 = vld [vmem:[#allocation3 + $0x240] sm:$0xff]  ;;  %v137_v31 = vld [vmem:[#allocation3 + $0x248] sm:$0xff] }
  0x14   :  { %v962_v10 = vmin.f32 %v930_v7, %v116_v6  ;;  %v138_v32 = vld [vmem:[#allocation3 + $0x250] sm:$0xff]  ;;  %v867_v35 = vmin.f32 %v136_v30, %v137_v31  ;;  %v123_v36 = vld [vmem:[#allocation3 + $0x1d8] sm:$0xff]  ;;  %v124_v42 = vld [vmem:[#allocation3 + $0x1e0] sm:$0xff] }
  0x15   :  { %v928_v23 = vmin.f32 %v896_v19, %v67_v17  ;;  %v71_v37 = vld [vmem:[#allocation3 + $0x38] sm:$0xff]  ;;  %v72_v43 = vld [vmem:[#allocation3 + $0x40] sm:$0xff]  ;;  %v125_v48 = vld [vmem:[#allocation3 + $0x1e8] sm:$0xff] }
  0x16   :  { %v994_v14 = vmin.f32 %v962_v10, %v117_v8  ;;  %v139_v38 = vld [vmem:[#allocation3 + $0x258] sm:$0xff]  ;;  %v899_v41 = vmin.f32 %v867_v35, %v138_v32  ;;  %v140_v44 = vld [vmem:[#allocation3 + $0x260] sm:$0xff]  ;;  %v73_v49 = vld [vmem:[#allocation3 + $0x48] sm:$0xff] }
  0x17   :  { %v960_v29 = vmin.f32 %v928_v23, %v68_v21  ;;  %v141_v50 = vld [vmem:[#allocation3 + $0x268] sm:$0xff]  ;;  %v126_v51 = vld [vmem:[#allocation3 + $0x1f0] sm:$0xff]  ;;  %v88_v57 = vld [vmem:[#allocation3 + $0xc0] sm:$0xff] }
  0x18   :  { %v1026_v18 = vmin.f32 %v994_v14, %v118_v9  ;;  %v931_v47 = vmin.f32 %v899_v41, %v139_v38  ;;  %v74_v53 = vld [vmem:[#allocation3 + $0x50] sm:$0xff]  ;;  %v89_v58 = vld [vmem:[#allocation3 + $0xc8] sm:$0xff]  ;;  %v127_v60 = vld [vmem:[#allocation3 + $0x1f8] sm:$0xff] }
  0x19   :  { %v992_v34 = vmin.f32 %v960_v29, %v69_v25  ;;  %v142_v55 = vld [vmem:[#allocation3 + $0x270] sm:$0xff]  ;;  %v865_v0 = vmin.f32 %v88_v57, %v89_v58  ;;  %v75_v1 = vld [vmem:[#allocation3 + $0x58] sm:$0xff]  ;;  %v128_v4 = vld [vmem:[#allocation3 + $0x200] sm:$0xff] }
  0x1a   :  { %v1058_v22 = vmin.f32 %v1026_v18, %v119_v16  ;;  %v963_v56 = vmin.f32 %v931_v47, %v140_v44  ;;  %v90_v59 = vld [vmem:[#allocation3 + $0xd0] sm:$0xff]  ;;  %v143_v2 = vld [vmem:[#allocation3 + $0x278] sm:$0xff]  ;;  %v76_v9 = vld [vmem:[#allocation3 + $0x60] sm:$0xff] }
  0x1b   :  { %v1024_v40 = vmin.f32 %v992_v34, %v70_v28  ;;  %v91_v3 = vld [vmem:[#allocation3 + $0xd8] sm:$0xff]  ;;  %v897_v8 = vmin.f32 %v865_v0, %v90_v59  ;;  %v144_v10 = vld [vmem:[#allocation3 + $0x280] sm:$0xff]  ;;  %v129_v12 = vld [vmem:[#allocation3 + $0x208] sm:$0xff] }
  0x1c   :  { %v1090_v27 = vmin.f32 %v1058_v22, %v120_v20  ;;  %v995_v63 = vmin.f32 %v963_v56, %v141_v50  ;;  %v92_v11 = vld [vmem:[#allocation3 + $0xe0] sm:$0xff]  ;;  %v77_v17 = vld [vmem:[#allocation3 + $0x68] sm:$0xff]  ;;  %v130_v20 = vld [vmem:[#allocation3 + $0x210] sm:$0xff] }
  0x1d   :  { %v1056_v46 = vmin.f32 %v1024_v40, %v71_v37  ;;  %v929_v16 = vmin.f32 %v897_v8, %v91_v3  ;;  %v145_v18 = vld [vmem:[#allocation3 + $0x288] sm:$0xff]  ;;  %v78_v22 = vld [vmem:[#allocation3 + $0x70] sm:$0xff]  ;;  %v184_v28 = vld [vmem:[#allocation3 + $0x3c0] sm:$0xff] }
  0x1e   :  { %v1122_v33 = vmin.f32 %v1090_v27, %v121_v24  ;;  %v1027_v7 = vmin.f32 %v995_v63, %v142_v55  ;;  %v93_v19 = vld [vmem:[#allocation3 + $0xe8] sm:$0xff]  ;;  %v146_v24 = vld [vmem:[#allocation3 + $0x290] sm:$0xff]  ;;  %v131_v30 = vld [vmem:[#allocation3 + $0x218] sm:$0xff] }
  0x1f   :  { %v1088_v54 = vmin.f32 %v1056_v46, %v72_v43  ;;  %v94_v27 = vld [vmem:[#allocation3 + $0xf0] sm:$0xff]  ;;  %v185_v29 = vld [vmem:[#allocation3 + $0x3c8] sm:$0xff]  ;;  %v147_v37 = vld [vmem:[#allocation3 + $0x298] sm:$0xff] }
  0x20   :  { %v1154_v39 = vmin.f32 %v1122_v33, %v122_v26  ;;  %v1059_v15 = vmin.f32 %v1027_v7, %v143_v2  ;;  %v961_v26 = vmin.f32 %v929_v16, %v92_v11  ;;  %v186_v35 = vld [vmem:[#allocation3 + $0x3d0] sm:$0xff]  ;;  %v95_v38 = vld [vmem:[#allocation3 + $0xf8] sm:$0xff]  ;;  %v132_v40 = vld [vmem:[#allocation3 + $0x220] sm:$0xff] }
  0x21   :  { %v1120_v62 = vmin.f32 %v1088_v54, %v73_v49  ;;  %v80_v46 = vld [vmem:[#allocation3 + $0x80] sm:$0xff]  ;;  %v133_v50 = vld [vmem:[#allocation3 + $0x228] sm:$0xff]  ;;  %v134_v56 = vld [vmem:[#allocation3 + $0x230] sm:$0xff] }
  0x22   :  { %v1186_v45 = vmin.f32 %v1154_v39, %v123_v36  ;;  %v1091_v25 = vmin.f32 %v1059_v15, %v144_v10  ;;  %v993_v34 = vmin.f32 %v961_v26, %v93_v19  ;;  %v79_v36 = vld [vmem:[#allocation3 + $0x78] sm:$0xff]  ;;  %v869_v39 = vmin.f32 %v184_v28, %v185_v29  ;;  %v148_v47 = vld [vmem:[#allocation3 + $0x2a0] sm:$0xff]  ;;  %v81_v57 = vld [vmem:[#allocation3 + $0x88] sm:$0xff] }
  0x23   :  { %v1152_v6 = vmin.f32 %v1120_v62, %v74_v53  ;;  %v188_v55 = vld [vmem:[#allocation3 + $0x3e0] sm:$0xff]  ;;  %v149_v58 = vld [vmem:[#allocation3 + $0x2a8] sm:$0xff]  ;;  %v82_v62 = vld [vmem:[#allocation3 + $0x90] sm:$0xff] }
  0x24   :  { %v1218_v52 = vmin.f32 %v1186_v45, %v124_v42  ;;  %v1123_v33 = vmin.f32 %v1091_v25, %v145_v18  ;;  %v1025_v44 = vmin.f32 %v993_v34, %v94_v27  ;;  %v187_v45 = vld [vmem:[#allocation3 + $0x3d8] sm:$0xff]  ;;  %v901_v49 = vmin.f32 %v869_v39, %v186_v35  ;;  %v97_v59 = vld [vmem:[#allocation3 + $0x108] sm:$0xff]  ;;  %v150_v0 = vld [vmem:[#allocation3 + $0x2b0] sm:$0xff] }
  0x25   :  { %v1184_v14 = vmin.f32 %v1152_v6, %v75_v1  ;;  %v189_v3 = vld [vmem:[#allocation3 + $0x3e8] sm:$0xff]  ;;  %v160_v6 = vld [vmem:[#allocation3 + $0x300] sm:$0xff]  ;;  %v135_v8 = vld [vmem:[#allocation3 + $0x238] sm:$0xff] }
  0x26   :  { %v1250_v61 = vmin.f32 %v1218_v52, %v125_v48  ;;  %v1155_v43 = vmin.f32 %v1123_v33, %v146_v24  ;;  %v96_v48 = vld [vmem:[#allocation3 + $0x100] sm:$0xff]  ;;  %v1057_v54 = vmin.f32 %v1025_v44, %v95_v38  ;;  %v161_v7 = vld [vmem:[#allocation3 + $0x308] sm:$0xff]  ;;  %v83_v15 = vld [vmem:[#allocation3 + $0x98] sm:$0xff] }
  0x27   :  { %v1216_v23 = vmin.f32 %v1184_v14, %v76_v9  ;;  %v162_v14 = vld [vmem:[#allocation3 + $0x310] sm:$0xff]  ;;  %v151_v16 = vld [vmem:[#allocation3 + $0x2b8] sm:$0xff]  ;;  %v868_v19 = vmin.f32 %v160_v6, %v161_v7  ;;  %v84_v26 = vld [vmem:[#allocation3 + $0xa0] sm:$0xff] }
  0x28   :  { %v1282_v5 = vmin.f32 %v1250_v61, %v126_v51  ;;  %v1187_v53 = vmin.f32 %v1155_v43, %v147_v37  ;;  %v1089_v2 = vmin.f32 %v1057_v54, %v96_v48  ;;  %v191_v24 = vld [vmem:[#allocation3 + $0x3f8] sm:$0xff]  ;;  %v152_v27 = vld [vmem:[#allocation3 + $0x2c0] sm:$0xff]  ;;  %v86_v38 = vld [vmem:[#allocation3 + $0xb0] sm:$0xff] }
  0x29   :  { %v1248_v32 = vmin.f32 %v1216_v23, %v77_v17  ;;  %v99_v17 = vld [vmem:[#allocation3 + $0x118] sm:$0xff]  ;;  %v100_v28 = vld [vmem:[#allocation3 + $0x120] sm:$0xff]  ;;  %v153_v39 = vld [vmem:[#allocation3 + $0x2c8] sm:$0xff] }
  0x2a   :  { %v1314_v13 = vmin.f32 %v1282_v5, %v127_v60  ;;  %v933_v60 = vmin.f32 %v901_v49, %v187_v45  ;;  %v1219_v1 = vmin.f32 %v1187_v53, %v148_v47  ;;  %v163_v25 = vld [vmem:[#allocation3 + $0x318] sm:$0xff]  ;;  %v164_v37 = vld [vmem:[#allocation3 + $0x320] sm:$0xff]  ;;  %v193_v48 = vld [vmem:[#allocation3 + $0x408] sm:$0xff] }
  0x2b   :  { %v1280_v42 = vmin.f32 %v1248_v32, %v78_v22  ;;  %v85_v32 = vld [vmem:[#allocation3 + $0xa8] sm:$0xff]  ;;  %v234_v54 = vld [vmem:[#allocation3 + $0x550] sm:$0xff]  ;;  %v195_v6 = vld [vmem:[#allocation3 + $0x418] sm:$0xff] }
  0x2c   :  { %v1346_v21 = vmin.f32 %v1314_v13, %v128_v4  ;;  %v98_v4 = vld [vmem:[#allocation3 + $0x110] sm:$0xff]  ;;  %v965_v5 = vmin.f32 %v933_v60, %v188_v55  ;;  %v1251_v11 = vmin.f32 %v1219_v1, %v149_v58  ;;  %v165_v49 = vld [vmem:[#allocation3 + $0x328] sm:$0xff]  ;;  %v87_v55 = vld [vmem:[#allocation3 + $0xb8] sm:$0xff] }
  0x2d   :  { %v1312_v52 = vmin.f32 %v1280_v42, %v79_v36  ;;  %v190_v13 = vld [vmem:[#allocation3 + $0x3f0] sm:$0xff]  ;;  %v192_v36 = vld [vmem:[#allocation3 + $0x400] sm:$0xff]  ;;  %v233_v53 = vld [vmem:[#allocation3 + $0x548] sm:$0xff] }
  0x2e   :  { %v1378_v31 = vmin.f32 %v1346_v21, %v129_v12  ;;  %v1121_v12 = vmin.f32 %v1089_v2, %v97_v59  ;;  %v997_v18 = vmin.f32 %v965_v5, %v189_v3  ;;  %v1283_v22 = vmin.f32 %v1251_v11, %v150_v0  ;;  %v194_v59 = vld [vmem:[#allocation3 + $0x410] sm:$0xff]  ;;  %v235_v2 = vld [vmem:[#allocation3 + $0x558] sm:$0xff] }
  0x2f   :  { %v1344_v63 = vmin.f32 %v1312_v52, %v80_v46  ;;  %v102_v46 = vld [vmem:[#allocation3 + $0x130] sm:$0xff]  ;;  %v232_v52 = vld [vmem:[#allocation3 + $0x540] sm:$0xff]  ;;  %v167_v7 = vld [vmem:[#allocation3 + $0x338] sm:$0xff] }
  0x30   :  { %v1410_v41 = vmin.f32 %v1378_v31, %v130_v20  ;;  %v1153_v23 = vmin.f32 %v1121_v12, %v98_v4  ;;  %v1029_v29 = vmin.f32 %v997_v18, %v190_v13  ;;  %v1315_v34 = vmin.f32 %v1283_v22, %v151_v16  ;;  %v166_v60 = vld [vmem:[#allocation3 + $0x330] sm:$0xff]  ;;  %v236_v13 = vld [vmem:[#allocation3 + $0x560] sm:$0xff]  ;;  %v105_v22 = vld [vmem:[#allocation3 + $0x148] sm:$0xff] }
  0x31   :  { %v1376_v10 = vmin.f32 %v1344_v63, %v81_v57  ;;  %v103_v63 = vld [vmem:[#allocation3 + $0x138] sm:$0xff]  ;;  %v196_v18 = vld [vmem:[#allocation3 + $0x420] sm:$0xff] }
  0x32   :  { %v1442_v51 = vmin.f32 %v1410_v41, %v131_v30  ;;  %v900_v30 = vmin.f32 %v868_v19, %v162_v14  ;;  %v1185_v35 = vmin.f32 %v1153_v23, %v99_v17  ;;  %v101_v41 = vld [vmem:[#allocation3 + $0x128] sm:$0xff]  ;;  %v1061_v42 = vmin.f32 %v1029_v29, %v191_v24  ;;  %v168_v19 = vld [vmem:[#allocation3 + $0x340] sm:$0xff]  ;;  %v106_v23 = vld [vmem:[#allocation3 + $0x150] sm:$0xff] }
  0x33   :  { %v1408_v21 = vmin.f32 %v1376_v10, %v82_v62  ;;  %v1347_v45 = vmin.f32 %v1315_v34, %v152_v27  ;;  %v155_v62 = vld [vmem:[#allocation3 + $0x2d8] sm:$0xff]  ;;  %v104_v10 = vld [vmem:[#allocation3 + $0x140] sm:$0xff]  ;;  %v197_v29 = vld [vmem:[#allocation3 + $0x428] sm:$0xff] }
  0x34   :  { %v1474_v61 = vmin.f32 %v1442_v51, %v132_v40  ;;  %v154_v40 = vld [vmem:[#allocation3 + $0x2d0] sm:$0xff]  ;;  %v932_v43 = vmin.f32 %v900_v30, %v163_v25  ;;  %v1217_v47 = vmin.f32 %v1185_v35, %v100_v28  ;;  %v169_v30 = vld [vmem:[#allocation3 + $0x348] sm:$0xff]  ;;  %v208_v35 = vld [vmem:[#allocation3 + $0x480] sm:$0xff] }
  0x35   :  { %v1440_v33 = vmin.f32 %v1408_v21, %v83_v15  ;;  %v1379_v57 = vmin.f32 %v1347_v45, %v153_v39  ;;  %v157_v15 = vld [vmem:[#allocation3 + $0x2e8] sm:$0xff]  ;;  %v158_v21 = vld [vmem:[#allocation3 + $0x2f0] sm:$0xff]  ;;  %v107_v45 = vld [vmem:[#allocation3 + $0x158] sm:$0xff] }
  0x36   :  { %v1506_v9 = vmin.f32 %v1474_v61, %v133_v50  ;;  %v1093_v50 = vmin.f32 %v1061_v42, %v192_v36  ;;  %v964_v51 = vmin.f32 %v932_v43, %v164_v37  ;;  %v1249_v58 = vmin.f32 %v1217_v47, %v101_v41  ;;  %v209_v36 = vld [vmem:[#allocation3 + $0x488] sm:$0xff]  ;;  %v210_v37 = vld [vmem:[#allocation3 + $0x490] sm:$0xff] }
  0x37   :  { %v1472_v44 = vmin.f32 %v1440_v33, %v84_v26  ;;  %v871_v61 = vmin.f32 %v232_v52, %v233_v53  ;;  %v1411_v4 = vmin.f32 %v1379_v57, %v154_v40  ;;  %v237_v26 = vld [vmem:[#allocation3 + $0x568] sm:$0xff]  ;;  %v198_v41 = vld [vmem:[#allocation3 + $0x430] sm:$0xff]  ;;  %v199_v52 = vld [vmem:[#allocation3 + $0x438] sm:$0xff] }
  0x38   :  { %v1538_v20 = vmin.f32 %v1506_v9, %v134_v56  ;;  %v1125_v0 = vmin.f32 %v1093_v50, %v193_v48  ;;  %v996_v1 = vmin.f32 %v964_v51, %v165_v49  ;;  %v1281_v5 = vmin.f32 %v1249_v58, %v102_v46  ;;  %v156_v9 = vld [vmem:[#allocation3 + $0x2e0] sm:$0xff]  ;;  %v170_v42 = vld [vmem:[#allocation3 + $0x350] sm:$0xff]  ;;  %v239_v48 = vld [vmem:[#allocation3 + $0x578] sm:$0xff] }
  0x39   :  { %v1504_v56 = vmin.f32 %v1472_v44, %v85_v32  ;;  %v1443_v16 = vmin.f32 %v1411_v4, %v155_v62  ;;  %v870_v44 = vmin.f32 %v208_v35, %v209_v36  ;;  %v211_v49 = vld [vmem:[#allocation3 + $0x498] sm:$0xff]  ;;  %v109_v62 = vld [vmem:[#allocation3 + $0x168] sm:$0xff]  ;;  %v110_v4 = vld [vmem:[#allocation3 + $0x170] sm:$0xff] }
  0x3a   :  { %v1570_v31 = vmin.f32 %v1538_v20, %v135_v8  ;;  %v903_v8 = vmin.f32 %v871_v61, %v234_v54  ;;  %v1157_v11 = vmin.f32 %v1125_v0, %v194_v59  ;;  %v1028_v12 = vmin.f32 %v996_v1, %v166_v60  ;;  %v171_v53 = vld [vmem:[#allocation3 + $0x358] sm:$0xff]  ;;  %v240_v59 = vld [vmem:[#allocation3 + $0x580] sm:$0xff] }
  0x3b   :  { %v1536_v3 = vmin.f32 %v1504_v56, %v86_v38  ;;  %v1313_v17 = vmin.f32 %v1281_v5, %v103_v63  ;;  %v1475_v27 = vmin.f32 %v1443_v16, %v156_v9  ;;  %v159_v38 = vld [vmem:[#allocation3 + $0x2f8] sm:$0xff]  ;;  %v108_v56 = vld [vmem:[#allocation3 + $0x160] sm:$0xff]  ;;  %v201_v5 = vld [vmem:[#allocation3 + $0x448] sm:$0xff] }
  0x3c   :  { %1703 = vmin.xlane.f32.xlu1 %v1570_v31  ;;  %v935_v20 = vmin.f32 %v903_v8, %v235_v2  ;;  %v1189_v24 = vmin.f32 %v1157_v11, %v195_v6  ;;  %v1060_v25 = vmin.f32 %v1028_v12, %v167_v7  ;;  %v238_v31 = vld [vmem:[#allocation3 + $0x570] sm:$0xff]  ;;  %v212_v60 = vld [vmem:[#allocation3 + $0x4a0] sm:$0xff]  ;;  %v241_v8 = vld [vmem:[#allocation3 + $0x588] sm:$0xff] }
  0x3d   :  { %v1568_v14 = vmin.f32 %v1536_v3, %v87_v55  ;;  %v1345_v28 = vmin.f32 %v1313_v17, %v104_v10  ;;  %v1507_v39 = vmin.f32 %v1475_v27, %v157_v15  ;;  %v902_v55 = vmin.f32 %v870_v44, %v210_v37  ;;  %v200_v0 = vld [vmem:[#allocation3 + $0x440] sm:$0xff]  ;;  %v213_v9 = vld [vmem:[#allocation3 + $0x4a8] sm:$0xff]  ;;  %v242_v12 = vld [vmem:[#allocation3 + $0x590] sm:$0xff] }
  0x3e   :  { %v967_v32 = vmin.f32 %v935_v20, %v236_v13  ;;  %v1221_v33 = vmin.f32 %v1189_v24, %v196_v18  ;;  %v1092_v34 = vmin.f32 %v1060_v25, %v168_v19  ;;  %v172_v1 = vld [vmem:[#allocation3 + $0x360] sm:$0xff]  ;;  %v173_v11 = vld [vmem:[#allocation3 + $0x368] sm:$0xff]  ;;  %v282_v20 = vld [vmem:[#allocation3 + $0x6d0] sm:$0xff] }
  0x3f   :  { %1699 = vmin.xlane.f32.xlu0 %v1568_v14  ;;  %v1377_v40 = vmin.f32 %v1345_v28, %v105_v22  ;;  %v1539_v50 = vmin.f32 %v1507_v39, %v158_v21  ;;  %v934_v3 = vmin.f32 %v902_v55, %v211_v49  ;;  %v214_v14 = vld [vmem:[#allocation3 + $0x4b0] sm:$0xff]  ;;  %v280_v18 = vld [vmem:[#allocation3 + $0x6c0] sm:$0xff]  ;;  %v281_v19 = vld [vmem:[#allocation3 + $0x6c8] sm:$0xff] }
  0x40   :  { %v999_v43 = vmin.f32 %v967_v32, %v237_v26  ;;  %v1253_v46 = vmin.f32 %v1221_v33, %v197_v29  ;;  %v1124_v47 = vmin.f32 %v1092_v34, %v169_v30  ;;  %v111_v21 = vld [vmem:[#allocation3 + $0x178] sm:$0xff]  ;;  %v174_v24 = vld [vmem:[#allocation3 + $0x370] sm:$0xff]  ;;  %v873_v27 = vmin.f32 %v280_v18, %v281_v19  ;;  %v204_v35 = vld [vmem:[#allocation3 + $0x460] sm:$0xff] }
  0x41   :  { %v1409_v51 = vmin.f32 %v1377_v40, %v106_v23  ;;  %v1571_v61 = vmin.f32 %v1539_v50, %v159_v38  ;;  %v966_v15 = vmin.f32 %v934_v3, %v212_v60  ;;  %v202_v23 = vld [vmem:[#allocation3 + $0x450] sm:$0xff]  ;;  %v243_v30 = vld [vmem:[#allocation3 + $0x598] sm:$0xff]  ;;  %v284_v44 = vld [vmem:[#allocation3 + $0x6e0] sm:$0xff] }
  0x42   :  { %v1031_v54 = vmin.f32 %v999_v43, %v238_v31  ;;  %v1285_v57 = vmin.f32 %v1253_v46, %v198_v41  ;;  %v1156_v58 = vmin.f32 %v1124_v47, %v170_v42  ;;  %v215_v31 = vld [vmem:[#allocation3 + $0x4b8] sm:$0xff]  ;;  %v905_v39 = vmin.f32 %v873_v27, %v282_v20  ;;  %v244_v42 = vld [vmem:[#allocation3 + $0x5a0] sm:$0xff]  ;;  %v205_v46 = vld [vmem:[#allocation3 + $0x468] sm:$0xff] }
  0x43   :  { %v1441_v63 = vmin.f32 %v1409_v51, %v107_v45  ;;  %1705 = vmin.xlane.f32.xlu1 %v1571_v61  ;;  %v998_v26 = vmin.f32 %v966_v15, %v213_v9  ;;  %v283_v32 = vld [vmem:[#allocation3 + $0x6d8] sm:$0xff]  ;;  %v216_v43 = vld [vmem:[#allocation3 + $0x4c0] sm:$0xff]  ;;  %v217_v55 = vld [vmem:[#allocation3 + $0x4c8] sm:$0xff] }
  0x44   :  { %v1063_v2 = vmin.f32 %v1031_v54, %v239_v48  ;;  %v1317_v6 = vmin.f32 %v1285_v57, %v199_v52  ;;  %v1188_v7 = vmin.f32 %v1156_v58, %v171_v53  ;;  %v203_v34 = vld [vmem:[#allocation3 + $0x458] sm:$0xff]  ;;  %v176_v47 = vld [vmem:[#allocation3 + $0x380] sm:$0xff]  ;;  %v177_v48 = vld [vmem:[#allocation3 + $0x388] sm:$0xff]  ;;  %v937_v51 = vmin.f32 %v905_v39, %v283_v32 }
  0x45   :  { %v1473_v10 = vmin.f32 %v1441_v63, %v108_v56  ;;  %v175_v36 = vld [vmem:[#allocation3 + $0x378] sm:$0xff]  ;;  %v1030_v38 = vmin.f32 %v998_v26, %v214_v14  ;;  %v245_v54 = vld [vmem:[#allocation3 + $0x5a8] sm:$0xff]  ;;  %v246_v57 = vld [vmem:[#allocation3 + $0x5b0] sm:$0xff] }
  0x46   :  { %v1095_v13 = vmin.f32 %v1063_v2, %v240_v59  ;;  %v1349_v16 = vmin.f32 %v1317_v6, %v200_v0  ;;  %v1220_v17 = vmin.f32 %v1188_v7, %v172_v1  ;;  %v285_v56 = vld [vmem:[#allocation3 + $0x6e8] sm:$0xff]  ;;  %v218_v59 = vld [vmem:[#allocation3 + $0x4d0] sm:$0xff]  ;;  %v256_v1 = vld [vmem:[#allocation3 + $0x600] sm:$0xff] }
  0x47   :  { %v1505_v22 = vmin.f32 %v1473_v10, %v109_v62  ;;  %v1062_v50 = vmin.f32 %v1030_v38, %v215_v31  ;;  %v286_v61 = vld [vmem:[#allocation3 + $0x6f0] sm:$0xff]  ;;  %v969_v62 = vmin.f32 %v937_v51, %v284_v44  ;;  %v257_v2 = vld [vmem:[#allocation3 + $0x608] sm:$0xff]  ;;  %v247_v6 = vld [vmem:[#allocation3 + $0x5b8] sm:$0xff] }
  0x48   :  { %v1127_v25 = vmin.f32 %v1095_v13, %v241_v8  ;;  %v1381_v28 = vmin.f32 %v1349_v16, %v201_v5  ;;  %v1252_v29 = vmin.f32 %v1220_v17, %v173_v11  ;;  %v258_v3 = vld [vmem:[#allocation3 + $0x610] sm:$0xff]  ;;  %v872_v10 = vmin.f32 %v256_v1, %v257_v2  ;;  %v219_v13 = vld [vmem:[#allocation3 + $0x4d8] sm:$0xff]  ;;  %v248_v18 = vld [vmem:[#allocation3 + $0x5c0] sm:$0xff] }
  0x49   :  { %v1537_v33 = vmin.f32 %v1505_v22, %v110_v4  ;;  %v1094_v60 = vmin.f32 %v1062_v50, %v216_v43  ;;  %v206_v4 = vld [vmem:[#allocation3 + $0x470] sm:$0xff]  ;;  %v1001_v9 = vmin.f32 %v969_v62, %v285_v56  ;;  %v287_v14 = vld [vmem:[#allocation3 + $0x6f8] sm:$0xff]  ;;  %v288_v26 = vld [vmem:[#allocation3 + $0x700] sm:$0xff] }
  0x4a   :  { %v1159_v37 = vmin.f32 %v1127_v25, %v242_v12  ;;  %v1413_v40 = vmin.f32 %v1381_v28, %v202_v23  ;;  %v1284_v41 = vmin.f32 %v1252_v29, %v174_v24  ;;  %v178_v5 = vld [vmem:[#allocation3 + $0x390] sm:$0xff]  ;;  %v259_v15 = vld [vmem:[#allocation3 + $0x618] sm:$0xff]  ;;  %v904_v22 = vmin.f32 %v872_v10, %v258_v3  ;;  %v220_v25 = vld [vmem:[#allocation3 + $0x4e0] sm:$0xff] }
  0x4b   :  { %v1569_v45 = vmin.f32 %v1537_v33, %v111_v21  ;;  %v1126_v8 = vmin.f32 %v1094_v60, %v217_v55  ;;  %v207_v16 = vld [vmem:[#allocation3 + $0x478] sm:$0xff]  ;;  %v1033_v21 = vmin.f32 %v1001_v9, %v286_v61  ;;  %v260_v27 = vld [vmem:[#allocation3 + $0x620] sm:$0xff]  ;;  %v181_v29 = vld [vmem:[#allocation3 + $0x3a8] sm:$0xff] }
  0x4c   :  { %v1191_v49 = vmin.f32 %v1159_v37, %v243_v30  ;;  %v1445_v52 = vmin.f32 %v1413_v40, %v203_v34  ;;  %v1316_v53 = vmin.f32 %v1284_v41, %v175_v36  ;;  %v179_v17 = vld [vmem:[#allocation3 + $0x398] sm:$0xff]  ;;  %v180_v28 = vld [vmem:[#allocation3 + $0x3a0] sm:$0xff]  ;;  %v249_v30 = vld [vmem:[#allocation3 + $0x5c8] sm:$0xff]  ;;  %v936_v34 = vmin.f32 %v904_v22, %v259_v15 }
  0x4d   :  { %1701 = vmin.xlane.f32.xlu0 %v1569_v45  ;;  %v1158_v20 = vmin.f32 %v1126_v8, %v218_v59  ;;  %v1065_v33 = vmin.f32 %v1033_v21, %v287_v14  ;;  %v221_v37 = vld [vmem:[#allocation3 + $0x4e8] sm:$0xff]  ;;  %v250_v40 = vld [vmem:[#allocation3 + $0x5d0] sm:$0xff]  ;;  %v223_v59 = vld [vmem:[#allocation3 + $0x4f8] sm:$0xff] }
  0x4e   :  { %v1223_v58 = vmin.f32 %v1191_v49, %v244_v42  ;;  %v1477_v63 = vmin.f32 %v1445_v52, %v204_v35  ;;  %v1348_v0 = vmin.f32 %v1316_v53, %v176_v47  ;;  %v289_v38 = vld [vmem:[#allocation3 + $0x708] sm:$0xff]  ;;  %v222_v42 = vld [vmem:[#allocation3 + $0x4f0] sm:$0xff]  ;;  %v328_v49 = vld [vmem:[#allocation3 + $0x840] sm:$0xff] }
  0x4f   :  { %v1190_v32 = vmin.f32 %v1158_v20, %v219_v13  ;;  %v261_v39 = vld [vmem:[#allocation3 + $0x628] sm:$0xff]  ;;  %v290_v44 = vld [vmem:[#allocation3 + $0x710] sm:$0xff]  ;;  %v1097_v45 = vmin.f32 %v1065_v33, %v288_v26  ;;  %v251_v52 = vld [vmem:[#allocation3 + $0x5d8] sm:$0xff] }
  0x50   :  { %v1255_v7 = vmin.f32 %v1223_v58, %v245_v54  ;;  %v1509_v11 = vmin.f32 %v1477_v63, %v205_v46  ;;  %v1380_v12 = vmin.f32 %v1348_v0, %v177_v48  ;;  %v968_v46 = vmin.f32 %v936_v34, %v260_v27  ;;  %v262_v48 = vld [vmem:[#allocation3 + $0x630] sm:$0xff]  ;;  %v329_v50 = vld [vmem:[#allocation3 + $0x848] sm:$0xff]  ;;  %v291_v60 = vld [vmem:[#allocation3 + $0x718] sm:$0xff] }
  0x51   :  { %v1222_v43 = vmin.f32 %v1190_v32, %v220_v25  ;;  %v182_v51 = vld [vmem:[#allocation3 + $0x3b0] sm:$0xff]  ;;  %v1129_v55 = vmin.f32 %v1097_v45, %v289_v38  ;;  %v263_v61 = vld [vmem:[#allocation3 + $0x638] sm:$0xff]  ;;  %v875_v62 = vmin.f32 %v328_v49, %v329_v50  ;;  %v252_v0 = vld [vmem:[#allocation3 + $0x5e0] sm:$0xff] }
  0x52   :  { %v1287_v19 = vmin.f32 %v1255_v7, %v246_v57  ;;  %v1541_v23 = vmin.f32 %v1509_v11, %v206_v4  ;;  %v1412_v24 = vmin.f32 %v1380_v12, %v178_v5  ;;  %v1000_v56 = vmin.f32 %v968_v46, %v261_v39  ;;  %v330_v57 = vld [vmem:[#allocation3 + $0x850] sm:$0xff]  ;;  %v183_v63 = vld [vmem:[#allocation3 + $0x3b8] sm:$0xff]  ;;  %v224_v7 = vld [vmem:[#allocation3 + $0x500] sm:$0xff] }
  0x53   :  { %v1254_v54 = vmin.f32 %v1222_v43, %v221_v37  ;;  %v1161_v3 = vmin.f32 %v1129_v55, %v290_v44  ;;  %v331_v5 = vld [vmem:[#allocation3 + $0x858] sm:$0xff]  ;;  %v292_v8 = vld [vmem:[#allocation3 + $0x720] sm:$0xff]  ;;  %v907_v10 = vmin.f32 %v875_v62, %v330_v57  ;;  %v253_v11 = vld [vmem:[#allocation3 + $0x5e8] sm:$0xff] }
  0x54   :  { %v1319_v31 = vmin.f32 %v1287_v19, %v247_v6  ;;  %v1573_v35 = vmin.f32 %v1541_v23, %v207_v16  ;;  %v1444_v36 = vmin.f32 %v1412_v24, %v179_v17  ;;  %v1032_v4 = vmin.f32 %v1000_v56, %v262_v48  ;;  %v264_v9 = vld [vmem:[#allocation3 + $0x640] sm:$0xff]  ;;  %v225_v19 = vld [vmem:[#allocation3 + $0x508] sm:$0xff]  ;;  %v226_v24 = vld [vmem:[#allocation3 + $0x510] sm:$0xff] }
  0x55   :  { %v1286_v2 = vmin.f32 %v1254_v54, %v222_v42  ;;  %v1193_v14 = vmin.f32 %v1161_v3, %v291_v60  ;;  %v332_v16 = vld [vmem:[#allocation3 + $0x860] sm:$0xff]  ;;  %v293_v20 = vld [vmem:[#allocation3 + $0x728] sm:$0xff]  ;;  %v939_v22 = vmin.f32 %v907_v10, %v331_v5  ;;  %v294_v26 = vld [vmem:[#allocation3 + $0x730] sm:$0xff] }
  0x56   :  { %v1351_v41 = vmin.f32 %v1319_v31, %v248_v18  ;;  %1709 = vmin.xlane.f32.xlu1 %v1573_v35  ;;  %v1476_v47 = vmin.f32 %v1444_v36, %v180_v28  ;;  %v1064_v15 = vmin.f32 %v1032_v4, %v263_v61  ;;  %v254_v18 = vld [vmem:[#allocation3 + $0x5f0] sm:$0xff]  ;;  %v265_v21 = vld [vmem:[#allocation3 + $0x648] sm:$0xff]  ;;  %v304_v32 = vld [vmem:[#allocation3 + $0x780] sm:$0xff] }
  0x57   :  { %v1318_v13 = vmin.f32 %v1286_v2, %v223_v59  ;;  %v1225_v27 = vmin.f32 %v1193_v14, %v292_v8  ;;  %v971_v31 = vmin.f32 %v939_v22, %v332_v16  ;;  %v305_v33 = vld [vmem:[#allocation3 + $0x788] sm:$0xff]  ;;  %v255_v34 = vld [vmem:[#allocation3 + $0x5f8] sm:$0xff]  ;;  %v334_v39 = vld [vmem:[#allocation3 + $0x870] sm:$0xff] }
  0x58   :  { %v1383_v53 = vmin.f32 %v1351_v41, %v249_v30  ;;  %v1508_v58 = vmin.f32 %v1476_v47, %v181_v29  ;;  %v1096_v28 = vmin.f32 %v1064_v15, %v264_v9  ;;  %v333_v29 = vld [vmem:[#allocation3 + $0x868] sm:$0xff]  ;;  %v266_v30 = vld [vmem:[#allocation3 + $0x650] sm:$0xff]  ;;  %v227_v41 = vld [vmem:[#allocation3 + $0x518] sm:$0xff]  ;;  %v874_v45 = vmin.f32 %v304_v32, %v305_v33 }
  0x59   :  { %v1350_v25 = vmin.f32 %v1318_v13, %v224_v7  ;;  %v1257_v37 = vmin.f32 %v1225_v27, %v293_v20  ;;  %v295_v42 = vld [vmem:[#allocation3 + $0x738] sm:$0xff]  ;;  %v1003_v44 = vmin.f32 %v971_v31, %v333_v29  ;;  %v268_v54 = vld [vmem:[#allocation3 + $0x660] sm:$0xff]  ;;  %v298_v2 = vld [vmem:[#allocation3 + $0x750] sm:$0xff] }
  0x5a   :  { %v1415_v1 = vmin.f32 %v1383_v53, %v250_v40  ;;  %v1540_v6 = vmin.f32 %v1508_v58, %v182_v51  ;;  %v1128_v38 = vmin.f32 %v1096_v28, %v265_v21  ;;  %v306_v40 = vld [vmem:[#allocation3 + $0x790] sm:$0xff]  ;;  %v267_v43 = vld [vmem:[#allocation3 + $0x658] sm:$0xff]  ;;  %v296_v53 = vld [vmem:[#allocation3 + $0x740] sm:$0xff] }
  0x5b   :  { %v1382_v36 = vmin.f32 %v1350_v25, %v225_v19  ;;  %v1289_v48 = vmin.f32 %v1257_v37, %v294_v26  ;;  %v335_v50 = vld [vmem:[#allocation3 + $0x878] sm:$0xff]  ;;  %v1035_v55 = vmin.f32 %v1003_v44, %v334_v39  ;;  %v906_v56 = vmin.f32 %v874_v45, %v306_v40  ;;  %v229_v58 = vld [vmem:[#allocation3 + $0x528] sm:$0xff]  ;;  %v336_v62 = vld [vmem:[#allocation3 + $0x880] sm:$0xff] }
  0x5c   :  { %v1447_v12 = vmin.f32 %v1415_v1, %v251_v52  ;;  %v1572_v17 = vmin.f32 %v1540_v6, %v183_v63  ;;  %v1160_v49 = vmin.f32 %v1128_v38, %v266_v30  ;;  %v307_v51 = vld [vmem:[#allocation3 + $0x798] sm:$0xff]  ;;  %v228_v52 = vld [vmem:[#allocation3 + $0x520] sm:$0xff]  ;;  %v297_v1 = vld [vmem:[#allocation3 + $0x748] sm:$0xff] }
  0x5d   :  { %v1414_v47 = vmin.f32 %v1382_v36, %v226_v24  ;;  %v1321_v60 = vmin.f32 %v1289_v48, %v295_v42  ;;  %v308_v63 = vld [vmem:[#allocation3 + $0x7a0] sm:$0xff]  ;;  %v269_v3 = vld [vmem:[#allocation3 + $0x668] sm:$0xff]  ;;  %v1067_v4 = vmin.f32 %v1035_v55, %v335_v50  ;;  %v938_v5 = vmin.f32 %v906_v56, %v307_v51  ;;  %v270_v8 = vld [vmem:[#allocation3 + $0x670] sm:$0xff] }
  0x5e   :  { %v1479_v23 = vmin.f32 %v1447_v12, %v252_v0  ;;  %1707 = vmin.xlane.f32.xlu0 %v1572_v17  ;;  %v1192_v61 = vmin.f32 %v1160_v49, %v267_v43  ;;  %v230_v0 = vld [vmem:[#allocation3 + $0x530] sm:$0xff]  ;;  %v337_v10 = vld [vmem:[#allocation3 + $0x888] sm:$0xff]  ;;  %v376_v14 = vld [vmem:[#allocation3 + $0x9c0] sm:$0xff] }
  0x5f   :  { %v1446_v59 = vmin.f32 %v1414_v47, %v227_v41  ;;  %v1353_v7 = vmin.f32 %v1321_v60, %v296_v53  ;;  %v1099_v12 = vmin.f32 %v1067_v4, %v336_v62  ;;  %v970_v13 = vmin.f32 %v938_v5, %v308_v63  ;;  %v377_v15 = vld [vmem:[#allocation3 + $0x9c8] sm:$0xff]  ;;  %v378_v16 = vld [vmem:[#allocation3 + $0x9d0] sm:$0xff]  ;;  %v231_v17 = vld [vmem:[#allocation3 + $0x538] sm:$0xff] }
  0x60   :  { %v1511_v35 = vmin.f32 %v1479_v23, %v253_v11  ;;  %v1224_v9 = vmin.f32 %v1192_v61, %v268_v54  ;;  %v309_v11 = vld [vmem:[#allocation3 + $0x7a8] sm:$0xff]  ;;  %v338_v21 = vld [vmem:[#allocation3 + $0x890] sm:$0xff]  ;;  %v877_v23 = vmin.f32 %v376_v14, %v377_v15  ;;  %v299_v24 = vld [vmem:[#allocation3 + $0x758] sm:$0xff] }
  0x61   :  { %v1478_v6 = vmin.f32 %v1446_v59, %v228_v52  ;;  %v1385_v19 = vmin.f32 %v1353_v7, %v297_v1  ;;  %v310_v22 = vld [vmem:[#allocation3 + $0x7b0] sm:$0xff]  ;;  %v271_v25 = vld [vmem:[#allocation3 + $0x678] sm:$0xff]  ;;  %v1131_v26 = vmin.f32 %v1099_v12, %v337_v10  ;;  %v1002_v27 = vmin.f32 %v970_v13, %v309_v11  ;;  %v272_v36 = vld [vmem:[#allocation3 + $0x680] sm:$0xff] }
  0x62   :  { %v1543_v46 = vmin.f32 %v1511_v35, %v254_v18  ;;  %v1256_v20 = vmin.f32 %v1224_v9, %v269_v3  ;;  %v379_v28 = vld [vmem:[#allocation3 + $0x9d8] sm:$0xff]  ;;  %v300_v35 = vld [vmem:[#allocation3 + $0x760] sm:$0xff]  ;;  %v301_v41 = vld [vmem:[#allocation3 + $0x768] sm:$0xff] }
  0x63   :  { %v1510_v18 = vmin.f32 %v1478_v6, %v229_v58  ;;  %v1417_v30 = vmin.f32 %v1385_v19, %v298_v2  ;;  %v339_v32 = vld [vmem:[#allocation3 + $0x898] sm:$0xff]  ;;  %v1163_v37 = vmin.f32 %v1131_v26, %v338_v21  ;;  %v1034_v38 = vmin.f32 %v1002_v27, %v310_v22  ;;  %v380_v39 = vld [vmem:[#allocation3 + $0x9e0] sm:$0xff]  ;;  %v302_v47 = vld [vmem:[#allocation3 + $0x770] sm:$0xff] }
  0x64   :  { %v1575_v57 = vmin.f32 %v1543_v46, %v255_v34  ;;  %v1288_v31 = vmin.f32 %v1256_v20, %v270_v8  ;;  %v311_v33 = vld [vmem:[#allocation3 + $0x7b8] sm:$0xff]  ;;  %v909_v34 = vmin.f32 %v877_v23, %v378_v16  ;;  %v340_v44 = vld [vmem:[#allocation3 + $0x8a0] sm:$0xff]  ;;  %v273_v48 = vld [vmem:[#allocation3 + $0x688] sm:$0xff] }
  0x65   :  { %v1542_v29 = vmin.f32 %v1510_v18, %v230_v0  ;;  %v1449_v42 = vmin.f32 %v1417_v30, %v299_v24  ;;  %v312_v45 = vld [vmem:[#allocation3 + $0x7c0] sm:$0xff]  ;;  %v274_v49 = vld [vmem:[#allocation3 + $0x690] sm:$0xff]  ;;  %v1195_v50 = vmin.f32 %v1163_v37, %v339_v32  ;;  %v1066_v51 = vmin.f32 %v1034_v38, %v311_v33  ;;  %v381_v52 = vld [vmem:[#allocation3 + $0x9e8] sm:$0xff] }
  0x66   :  { %1713 = vmin.xlane.f32.xlu1 %v1575_v57  ;;  %v1320_v43 = vmin.f32 %v1288_v31, %v271_v25  ;;  %v941_v46 = vmin.f32 %v909_v34, %v379_v28  ;;  %v341_v55 = vld [vmem:[#allocation3 + $0x8a8] sm:$0xff]  ;;  %v382_v57 = vld [vmem:[#allocation3 + $0x9f0] sm:$0xff]  ;;  %v352_v61 = vld [vmem:[#allocation3 + $0x900] sm:$0xff] }
  0x67   :  { %v1574_v40 = vmin.f32 %v1542_v29, %v231_v17  ;;  %v1481_v53 = vmin.f32 %v1449_v42, %v300_v35  ;;  %v313_v56 = vld [vmem:[#allocation3 + $0x7c8] sm:$0xff]  ;;  %v1227_v59 = vmin.f32 %v1195_v50, %v340_v44  ;;  %v1098_v60 = vmin.f32 %v1066_v51, %v312_v45  ;;  %v354_v63 = vld [vmem:[#allocation3 + $0x910] sm:$0xff]  ;;  %v303_v0 = vld [vmem:[#allocation3 + $0x778] sm:$0xff] }
  0x68   :  { %v1352_v54 = vmin.f32 %v1320_v43, %v272_v36  ;;  %v973_v58 = vmin.f32 %v941_v46, %v380_v39  ;;  %v353_v62 = vld [vmem:[#allocation3 + $0x908] sm:$0xff]  ;;  %v342_v3 = vld [vmem:[#allocation3 + $0x8b0] sm:$0xff]  ;;  %v275_v7 = vld [vmem:[#allocation3 + $0x698] sm:$0xff] }
  0x69   :  { %1711 = vmin.xlane.f32.xlu0 %v1574_v40  ;;  %v1513_v1 = vmin.f32 %v1481_v53, %v301_v41  ;;  %v314_v4 = vld [vmem:[#allocation3 + $0x7d0] sm:$0xff]  ;;  %v876_v6 = vmin.f32 %v352_v61, %v353_v62  ;;  %v1259_v8 = vmin.f32 %v1227_v59, %v341_v55  ;;  %v1130_v9 = vmin.f32 %v1098_v60, %v313_v56  ;;  %v383_v10 = vld [vmem:[#allocation3 + $0x9f8] sm:$0xff]  ;;  %v276_v18 = vld [vmem:[#allocation3 + $0x6a0] sm:$0xff] }
  0x6a   :  { %v1384_v2 = vmin.f32 %v1352_v54, %v273_v48  ;;  %v1005_v5 = vmin.f32 %v973_v58, %v381_v52  ;;  %v355_v11 = vld [vmem:[#allocation3 + $0x918] sm:$0xff]  ;;  %v384_v21 = vld [vmem:[#allocation3 + $0xa00] sm:$0xff]  ;;  %v277_v24 = vld [vmem:[#allocation3 + $0x6a8] sm:$0xff] }
  0x6b   :  { %v1545_v12 = vmin.f32 %v1513_v1, %v302_v47  ;;  %v343_v14 = vld [vmem:[#allocation3 + $0x8b8] sm:$0xff]  ;;  %v908_v17 = vmin.f32 %v876_v6, %v354_v63  ;;  %v1291_v19 = vmin.f32 %v1259_v8, %v342_v3  ;;  %v1162_v20 = vmin.f32 %v1130_v9, %v314_v4  ;;  %v356_v22 = vld [vmem:[#allocation3 + $0x920] sm:$0xff]  ;;  %v278_v30 = vld [vmem:[#allocation3 + $0x6b0] sm:$0xff] }
  0x6c   :  { %v1416_v13 = vmin.f32 %v1384_v2, %v274_v49  ;;  %v315_v15 = vld [vmem:[#allocation3 + $0x7d8] sm:$0xff]  ;;  %v1037_v16 = vmin.f32 %v1005_v5, %v382_v57  ;;  %v344_v26 = vld [vmem:[#allocation3 + $0x8c0] sm:$0xff]  ;;  %v345_v31 = vld [vmem:[#allocation3 + $0x8c8] sm:$0xff] }
  0x6d   :  { %v1577_v23 = vmin.f32 %v1545_v12, %v303_v0  ;;  %v316_v27 = vld [vmem:[#allocation3 + $0x7e0] sm:$0xff]  ;;  %v940_v29 = vmin.f32 %v908_v17, %v355_v11  ;;  %v1323_v32 = vmin.f32 %v1291_v19, %v343_v14  ;;  %v1194_v33 = vmin.f32 %v1162_v20, %v315_v15  ;;  %v385_v34 = vld [vmem:[#allocation3 + $0xa08] sm:$0xff]  ;;  %v386_v38 = vld [vmem:[#allocation3 + $0xa10] sm:$0xff] }
  0x6e   :  { %v1448_v25 = vmin.f32 %v1416_v13, %v275_v7  ;;  %v1069_v28 = vmin.f32 %v1037_v16, %v383_v10  ;;  %v357_v35 = vld [vmem:[#allocation3 + $0x928] sm:$0xff]  ;;  %v358_v40 = vld [vmem:[#allocation3 + $0x930] sm:$0xff]  ;;  %v424_v44 = vld [vmem:[#allocation3 + $0xb40] sm:$0xff] }
  0x6f   :  { %1717 = vmin.xlane.f32.xlu1 %v1577_v23  ;;  %v317_v37 = vld [vmem:[#allocation3 + $0x7e8] sm:$0xff]  ;;  %v972_v41 = vmin.f32 %v940_v29, %v356_v22  ;;  %v1355_v42 = vmin.f32 %v1323_v32, %v344_v26  ;;  %v1226_v43 = vmin.f32 %v1194_v33, %v316_v27  ;;  %v426_v46 = vld [vmem:[#allocation3 + $0xb50] sm:$0xff]  ;;  %v279_v47 = vld [vmem:[#allocation3 + $0x6b8] sm:$0xff] }
  0x70   :  { %v1480_v36 = vmin.f32 %v1448_v25, %v276_v18  ;;  %v1101_v39 = vmin.f32 %v1069_v28, %v384_v21  ;;  %v425_v45 = vld [vmem:[#allocation3 + $0xb48] sm:$0xff]  ;;  %v346_v49 = vld [vmem:[#allocation3 + $0x8d0] sm:$0xff]  ;;  %v387_v56 = vld [vmem:[#allocation3 + $0xa18] sm:$0xff] }
  0x71   :  { %v318_v50 = vld [vmem:[#allocation3 + $0x7f0] sm:$0xff]  ;;  %v1004_v52 = vmin.f32 %v972_v41, %v357_v35  ;;  %v879_v53 = vmin.f32 %v424_v44, %v425_v45  ;;  %v1387_v54 = vmin.f32 %v1355_v42, %v345_v31  ;;  %v1258_v55 = vmin.f32 %v1226_v43, %v317_v37  ;;  %v359_v57 = vld [vmem:[#allocation3 + $0x938] sm:$0xff]  ;;  %v348_v61 = vld [vmem:[#allocation3 + $0x8e0] sm:$0xff] }
  0x72   :  { %v1512_v48 = vmin.f32 %v1480_v36, %v277_v24  ;;  %v1133_v51 = vmin.f32 %v1101_v39, %v385_v34  ;;  %v427_v58 = vld [vmem:[#allocation3 + $0xb58] sm:$0xff]  ;;  %v388_v4 = vld [vmem:[#allocation3 + $0xa20] sm:$0xff]  ;;  %v349_v8 = vld [vmem:[#allocation3 + $0x8e8] sm:$0xff] }
  0x73   :  { %v347_v60 = vld [vmem:[#allocation3 + $0x8d8] sm:$0xff]  ;;  %v1036_v0 = vmin.f32 %v1004_v52, %v358_v40  ;;  %v911_v1 = vmin.f32 %v879_v53, %v426_v46  ;;  %v1419_v2 = vmin.f32 %v1387_v54, %v346_v49  ;;  %v1290_v3 = vmin.f32 %v1258_v55, %v318_v50  ;;  %v360_v5 = vld [vmem:[#allocation3 + $0x940] sm:$0xff]  ;;  %v321_v10 = vld [vmem:[#allocation3 + $0x808] sm:$0xff] }
  0x74   :  { %v1544_v59 = vmin.f32 %v1512_v48, %v278_v30  ;;  %v319_v62 = vld [vmem:[#allocation3 + $0x7f8] sm:$0xff]  ;;  %v1165_v63 = vmin.f32 %v1133_v51, %v386_v38  ;;  %v428_v6 = vld [vmem:[#allocation3 + $0xb60] sm:$0xff]  ;;  %v389_v16 = vld [vmem:[#allocation3 + $0xa28] sm:$0xff] }
  0x75   :  { %v320_v9 = vld [vmem:[#allocation3 + $0x800] sm:$0xff]  ;;  %v1068_v12 = vmin.f32 %v1036_v0, %v359_v57  ;;  %v943_v13 = vmin.f32 %v911_v1, %v427_v58  ;;  %v1451_v14 = vmin.f32 %v1419_v2, %v347_v60  ;;  %v1322_v15 = vmin.f32 %v1290_v3, %v319_v62  ;;  %v361_v17 = vld [vmem:[#allocation3 + $0x948] sm:$0xff]  ;;  %v390_v19 = vld [vmem:[#allocation3 + $0xa30] sm:$0xff] }
  0x76   :  { %v1576_v7 = vmin.f32 %v1544_v59, %v279_v47  ;;  %v1197_v11 = vmin.f32 %v1165_v63, %v387_v56  ;;  %v429_v18 = vld [vmem:[#allocation3 + $0xb68] sm:$0xff]  ;;  %v362_v21 = vld [vmem:[#allocation3 + $0x950] sm:$0xff]  ;;  %v400_v27 = vld [vmem:[#allocation3 + $0xa80] sm:$0xff] }
  0x77   :  { %v1100_v22 = vmin.f32 %v1068_v12, %v360_v5  ;;  %v430_v23 = vld [vmem:[#allocation3 + $0xb70] sm:$0xff]  ;;  %v975_v24 = vmin.f32 %v943_v13, %v428_v6  ;;  %v1483_v25 = vmin.f32 %v1451_v14, %v348_v61  ;;  %v1354_v26 = vmin.f32 %v1322_v15, %v320_v9  ;;  %v401_v28 = vld [vmem:[#allocation3 + $0xa88] sm:$0xff]  ;;  %v391_v32 = vld [vmem:[#allocation3 + $0xa38] sm:$0xff] }
  0x78   :  { %1715 = vmin.xlane.f32.xlu0 %v1576_v7  ;;  %v1229_v20 = vmin.f32 %v1197_v11, %v388_v4  ;;  %v402_v29 = vld [vmem:[#allocation3 + $0xa90] sm:$0xff]  ;;  %v878_v36 = vmin.f32 %v400_v27, %v401_v28  ;;  %v363_v39 = vld [vmem:[#allocation3 + $0x958] sm:$0xff]  ;;  %v392_v44 = vld [vmem:[#allocation3 + $0xa40] sm:$0xff] }
  0x79   :  { %v350_v30 = vld [vmem:[#allocation3 + $0x8f0] sm:$0xff]  ;;  %v1132_v34 = vmin.f32 %v1100_v22, %v361_v17  ;;  %v1007_v35 = vmin.f32 %v975_v24, %v429_v18  ;;  %v1515_v37 = vmin.f32 %v1483_v25, %v349_v8  ;;  %v1386_v38 = vmin.f32 %v1354_v26, %v321_v10  ;;  %v431_v40 = vld [vmem:[#allocation3 + $0xb78] sm:$0xff]  ;;  %v364_v51 = vld [vmem:[#allocation3 + $0x960] sm:$0xff] }
  0x7a   :  { %v322_v31 = vld [vmem:[#allocation3 + $0x810] sm:$0xff]  ;;  %v1261_v33 = vmin.f32 %v1229_v20, %v389_v16  ;;  %v403_v41 = vld [vmem:[#allocation3 + $0xa98] sm:$0xff]  ;;  %v910_v48 = vmin.f32 %v878_v36, %v402_v29  ;;  %v432_v52 = vld [vmem:[#allocation3 + $0xb80] sm:$0xff] }
  0x7b   :  { %v351_v42 = vld [vmem:[#allocation3 + $0x8f8] sm:$0xff]  ;;  %v1164_v46 = vmin.f32 %v1132_v34, %v362_v21  ;;  %v1039_v47 = vmin.f32 %v1007_v35, %v430_v23  ;;  %v1547_v49 = vmin.f32 %v1515_v37, %v350_v30  ;;  %v1418_v50 = vmin.f32 %v1386_v38, %v322_v31  ;;  %v404_v53 = vld [vmem:[#allocation3 + $0xaa0] sm:$0xff]  ;;  %v325_v55 = vld [vmem:[#allocation3 + $0x828] sm:$0xff] }
  0x7c   :  { %v323_v43 = vld [vmem:[#allocation3 + $0x818] sm:$0xff]  ;;  %v1293_v45 = vmin.f32 %v1261_v33, %v390_v19  ;;  %v324_v54 = vld [vmem:[#allocation3 + $0x820] sm:$0xff]  ;;  %v393_v56 = vld [vmem:[#allocation3 + $0xa48] sm:$0xff]  ;;  %v942_v60 = vmin.f32 %v910_v48, %v403_v41 }
  0x7d   :  { %v1196_v58 = vmin.f32 %v1164_v46, %v363_v39  ;;  %v1071_v59 = vmin.f32 %v1039_v47, %v431_v40  ;;  %v1579_v61 = vmin.f32 %v1547_v49, %v351_v42  ;;  %v1450_v62 = vmin.f32 %v1418_v50, %v323_v43  ;;  %v365_v63 = vld [vmem:[#allocation3 + $0x968] sm:$0xff]  ;;  %v394_v2 = vld [vmem:[#allocation3 + $0xa50] sm:$0xff]  ;;  %v472_v11 = vld [vmem:[#allocation3 + $0xcc0] sm:$0xff] }
  0x7e   :  { %v1325_v57 = vmin.f32 %v1293_v45, %v391_v32  ;;  %v433_v0 = vld [vmem:[#allocation3 + $0xb88] sm:$0xff]  ;;  %v366_v4 = vld [vmem:[#allocation3 + $0x970] sm:$0xff]  ;;  %v974_v8 = vmin.f32 %v942_v60, %v404_v53  ;;  %v395_v14 = vld [vmem:[#allocation3 + $0xa58] sm:$0xff] }
  0x7f   :  { %v405_v1 = vld [vmem:[#allocation3 + $0xaa8] sm:$0xff]  ;;  %v1228_v5 = vmin.f32 %v1196_v58, %v364_v51  ;;  %v434_v6 = vld [vmem:[#allocation3 + $0xb90] sm:$0xff]  ;;  %v1103_v7 = vmin.f32 %v1071_v59, %v432_v52  ;;  %1721 = vmin.xlane.f32.xlu1 %v1579_v61  ;;  %v1482_v9 = vmin.f32 %v1450_v62, %v324_v54  ;;  %v367_v21 = vld [vmem:[#allocation3 + $0x978] sm:$0xff] }
  0x80   :  { %v1357_v3 = vmin.f32 %v1325_v57, %v392_v44  ;;  %v406_v10 = vld [vmem:[#allocation3 + $0xab0] sm:$0xff]  ;;  %v473_v12 = vld [vmem:[#allocation3 + $0xcc8] sm:$0xff]  ;;  %v1006_v18 = vmin.f32 %v974_v8, %v405_v1  ;;  %v435_v22 = vld [vmem:[#allocation3 + $0xb98] sm:$0xff] }
  0x81   :  { %v326_v13 = vld [vmem:[#allocation3 + $0x830] sm:$0xff]  ;;  %v1260_v16 = vmin.f32 %v1228_v5, %v365_v63  ;;  %v1135_v17 = vmin.f32 %v1103_v7, %v433_v0  ;;  %v1514_v20 = vmin.f32 %v1482_v9, %v325_v55  ;;  %v407_v23 = vld [vmem:[#allocation3 + $0xab8] sm:$0xff]  ;;  %v881_v24 = vmin.f32 %v472_v11, %v473_v12  ;;  %v396_v26 = vld [vmem:[#allocation3 + $0xa60] sm:$0xff] }
  0x82   :  { %v1389_v15 = vmin.f32 %v1357_v3, %v393_v56  ;;  %v474_v19 = vld [vmem:[#allocation3 + $0xcd0] sm:$0xff]  ;;  %v327_v25 = vld [vmem:[#allocation3 + $0x838] sm:$0xff]  ;;  %v1038_v30 = vmin.f32 %v1006_v18, %v406_v10  ;;  %v368_v33 = vld [vmem:[#allocation3 + $0x980] sm:$0xff] }
  0x83   :  { %v1292_v28 = vmin.f32 %v1260_v16, %v366_v4  ;;  %v1167_v29 = vmin.f32 %v1135_v17, %v434_v6  ;;  %v475_v31 = vld [vmem:[#allocation3 + $0xcd8] sm:$0xff]  ;;  %v1546_v32 = vmin.f32 %v1514_v20, %v326_v13  ;;  %v436_v34 = vld [vmem:[#allocation3 + $0xba0] sm:$0xff]  ;;  %v913_v36 = vmin.f32 %v881_v24, %v474_v19  ;;  %v397_v37 = vld [vmem:[#allocation3 + $0xa68] sm:$0xff] }
  0x84   :  { %v1421_v27 = vmin.f32 %v1389_v15, %v394_v2  ;;  %v408_v35 = vld [vmem:[#allocation3 + $0xac0] sm:$0xff]  ;;  %v1070_v41 = vmin.f32 %v1038_v30, %v407_v23  ;;  %v398_v44 = vld [vmem:[#allocation3 + $0xa70] sm:$0xff]  ;;  %v369_v45 = vld [vmem:[#allocation3 + $0x988] sm:$0xff] }
  0x85   :  { %v1324_v39 = vmin.f32 %v1292_v28, %v367_v21  ;;  %v1199_v40 = vmin.f32 %v1167_v29, %v435_v22  ;;  %v476_v42 = vld [vmem:[#allocation3 + $0xce0] sm:$0xff]  ;;  %v1578_v43 = vmin.f32 %v1546_v32, %v327_v25  ;;  %v437_v46 = vld [vmem:[#allocation3 + $0xba8] sm:$0xff]  ;;  %v945_v48 = vmin.f32 %v913_v36, %v475_v31  ;;  %v370_v50 = vld [vmem:[#allocation3 + $0x990] sm:$0xff] }
  0x86   :  { %v1453_v38 = vmin.f32 %v1421_v27, %v395_v14  ;;  %v409_v47 = vld [vmem:[#allocation3 + $0xac8] sm:$0xff]  ;;  %v438_v52 = vld [vmem:[#allocation3 + $0xbb0] sm:$0xff]  ;;  %v1102_v54 = vmin.f32 %v1070_v41, %v408_v35  ;;  %v448_v58 = vld [vmem:[#allocation3 + $0xc00] sm:$0xff] }
  0x87   :  { %v1356_v51 = vmin.f32 %v1324_v39, %v368_v33  ;;  %v1231_v53 = vmin.f32 %v1199_v40, %v436_v34  ;;  %v477_v55 = vld [vmem:[#allocation3 + $0xce8] sm:$0xff]  ;;  %1719 = vmin.xlane.f32.xlu0 %v1578_v43  ;;  %v410_v56 = vld [vmem:[#allocation3 + $0xad0] sm:$0xff]  ;;  %v977_v57 = vmin.f32 %v945_v48, %v476_v42  ;;  %v399_v60 = vld [vmem:[#allocation3 + $0xa78] sm:$0xff] }
  0x88   :  { %v1485_v49 = vmin.f32 %v1453_v38, %v396_v26  ;;  %v449_v59 = vld [vmem:[#allocation3 + $0xc08] sm:$0xff]  ;;  %v1134_v0 = vmin.f32 %v1102_v54, %v409_v47  ;;  %v478_v1 = vld [vmem:[#allocation3 + $0xcf0] sm:$0xff]  ;;  %v371_v3 = vld [vmem:[#allocation3 + $0x998] sm:$0xff] }
  0x89   :  { %v1388_v62 = vmin.f32 %v1356_v51, %v369_v45  ;;  %v1263_v63 = vmin.f32 %v1231_v53, %v437_v46  ;;  %v450_v2 = vld [vmem:[#allocation3 + $0xc10] sm:$0xff]  ;;  %v439_v4 = vld [vmem:[#allocation3 + $0xbb8] sm:$0xff]  ;;  %v1009_v6 = vmin.f32 %v977_v57, %v477_v55  ;;  %v880_v7 = vmin.f32 %v448_v58, %v449_v59  ;;  %v372_v14 = vld [vmem:[#allocation3 + $0x9a0] sm:$0xff] }
  0x8a   :  { %v1517_v61 = vmin.f32 %v1485_v49, %v397_v37  ;;  %v411_v5 = vld [vmem:[#allocation3 + $0xad8] sm:$0xff]  ;;  %v1166_v11 = vmin.f32 %v1134_v0, %v410_v56  ;;  %v440_v15 = vld [vmem:[#allocation3 + $0xbc0] sm:$0xff]  ;;  %v373_v20 = vld [vmem:[#allocation3 + $0x9a8] sm:$0xff] }
  0x8b   :  { %v1420_v9 = vmin.f32 %v1388_v62, %v370_v50  ;;  %v1295_v10 = vmin.f32 %v1263_v63, %v438_v52  ;;  %v479_v12 = vld [vmem:[#allocation3 + $0xcf8] sm:$0xff]  ;;  %v412_v16 = vld [vmem:[#allocation3 + $0xae0] sm:$0xff]  ;;  %v1041_v17 = vmin.f32 %v1009_v6, %v478_v1  ;;  %v912_v18 = vmin.f32 %v880_v7, %v450_v2  ;;  %v374_v26 = vld [vmem:[#allocation3 + $0x9b0] sm:$0xff] }
  0x8c   :  { %v1549_v8 = vmin.f32 %v1517_v61, %v398_v44  ;;  %v451_v13 = vld [vmem:[#allocation3 + $0xc18] sm:$0xff]  ;;  %v1198_v23 = vmin.f32 %v1166_v11, %v411_v5  ;;  %v480_v24 = vld [vmem:[#allocation3 + $0xd00] sm:$0xff]  ;;  %v441_v27 = vld [vmem:[#allocation3 + $0xbc8] sm:$0xff] }
  0x8d   :  { %v1452_v21 = vmin.f32 %v1420_v9, %v371_v3  ;;  %v1327_v22 = vmin.f32 %v1295_v10, %v439_v4  ;;  %v452_v25 = vld [vmem:[#allocation3 + $0xc20] sm:$0xff]  ;;  %v442_v28 = vld [vmem:[#allocation3 + $0xbd0] sm:$0xff]  ;;  %v413_v29 = vld [vmem:[#allocation3 + $0xae8] sm:$0xff]  ;;  %v1073_v30 = vmin.f32 %v1041_v17, %v479_v12  ;;  %v944_v31 = vmin.f32 %v912_v18, %v451_v13 }
  0x8e   :  { %v1581_v19 = vmin.f32 %v1549_v8, %v399_v60  ;;  %v414_v34 = vld [vmem:[#allocation3 + $0xaf0] sm:$0xff]  ;;  %v1230_v35 = vmin.f32 %v1198_v23, %v412_v16  ;;  %v481_v36 = vld [vmem:[#allocation3 + $0xd08] sm:$0xff]  ;;  %v520_v40 = vld [vmem:[#allocation3 + $0xe40] sm:$0xff] }
  0x8f   :  { %v1484_v32 = vmin.f32 %v1452_v21, %v372_v14  ;;  %v1359_v33 = vmin.f32 %v1327_v22, %v440_v15  ;;  %v453_v37 = vld [vmem:[#allocation3 + $0xc28] sm:$0xff]  ;;  %v1105_v38 = vmin.f32 %v1073_v30, %v480_v24  ;;  %v976_v39 = vmin.f32 %v944_v31, %v452_v25  ;;  %v522_v42 = vld [vmem:[#allocation3 + $0xe50] sm:$0xff]  ;;  %v375_v43 = vld [vmem:[#allocation3 + $0x9b8] sm:$0xff] }
  0x90   :  { %1725 = vmin.xlane.f32.xlu1 %v1581_v19  ;;  %v521_v41 = vld [vmem:[#allocation3 + $0xe48] sm:$0xff]  ;;  %v1262_v46 = vmin.f32 %v1230_v35, %v413_v29  ;;  %v482_v47 = vld [vmem:[#allocation3 + $0xd10] sm:$0xff]  ;;  %v443_v50 = vld [vmem:[#allocation3 + $0xbd8] sm:$0xff] }
  0x91   :  { %v1516_v44 = vmin.f32 %v1484_v32, %v373_v20  ;;  %v1391_v45 = vmin.f32 %v1359_v33, %v441_v27  ;;  %v454_v48 = vld [vmem:[#allocation3 + $0xc30] sm:$0xff]  ;;  %v883_v49 = vmin.f32 %v520_v40, %v521_v41  ;;  %v415_v51 = vld [vmem:[#allocation3 + $0xaf8] sm:$0xff]  ;;  %v1137_v52 = vmin.f32 %v1105_v38, %v481_v36  ;;  %v444_v61 = vld [vmem:[#allocation3 + $0xbe0] sm:$0xff] }
  0x92   :  { %v1008_v53 = vmin.f32 %v976_v39, %v453_v37  ;;  %v523_v54 = vld [vmem:[#allocation3 + $0xe58] sm:$0xff]  ;;  %v1294_v57 = vmin.f32 %v1262_v46, %v414_v34  ;;  %v416_v62 = vld [vmem:[#allocation3 + $0xb00] sm:$0xff]  ;;  %v445_v3 = vld [vmem:[#allocation3 + $0xbe8] sm:$0xff] }
  0x93   :  { %v1548_v55 = vmin.f32 %v1516_v44, %v374_v26  ;;  %v1423_v56 = vmin.f32 %v1391_v45, %v442_v28  ;;  %v483_v58 = vld [vmem:[#allocation3 + $0xd18] sm:$0xff]  ;;  %v915_v60 = vmin.f32 %v883_v49, %v522_v42  ;;  %v1169_v63 = vmin.f32 %v1137_v52, %v482_v47  ;;  %v524_v1 = vld [vmem:[#allocation3 + $0xe60] sm:$0xff]  ;;  %v446_v9 = vld [vmem:[#allocation3 + $0xbf0] sm:$0xff] }
  0x94   :  { %v455_v59 = vld [vmem:[#allocation3 + $0xc38] sm:$0xff]  ;;  %v1040_v0 = vmin.f32 %v1008_v53, %v454_v48  ;;  %v1326_v5 = vmin.f32 %v1294_v57, %v415_v51  ;;  %v484_v6 = vld [vmem:[#allocation3 + $0xd20] sm:$0xff]  ;;  %v417_v10 = vld [vmem:[#allocation3 + $0xb08] sm:$0xff] }
  0x95   :  { %v1580_v2 = vmin.f32 %v1548_v55, %v375_v43  ;;  %v1455_v4 = vmin.f32 %v1423_v56, %v443_v50  ;;  %v456_v7 = vld [vmem:[#allocation3 + $0xc40] sm:$0xff]  ;;  %v947_v8 = vmin.f32 %v915_v60, %v523_v54  ;;  %v418_v11 = vld [vmem:[#allocation3 + $0xb10] sm:$0xff]  ;;  %v1201_v12 = vmin.f32 %v1169_v63, %v483_v58  ;;  %v525_v14 = vld [vmem:[#allocation3 + $0xe68] sm:$0xff] }
  0x96   :  { %v1072_v13 = vmin.f32 %v1040_v0, %v455_v59  ;;  %v1358_v16 = vmin.f32 %v1326_v5, %v416_v62  ;;  %v485_v17 = vld [vmem:[#allocation3 + $0xd28] sm:$0xff]  ;;  %v526_v19 = vld [vmem:[#allocation3 + $0xe70] sm:$0xff]  ;;  %v496_v23 = vld [vmem:[#allocation3 + $0xd80] sm:$0xff] }
  0x97   :  { %1723 = vmin.xlane.f32.xlu0 %v1580_v2  ;;  %v1487_v15 = vmin.f32 %v1455_v4, %v444_v61  ;;  %v457_v18 = vld [vmem:[#allocation3 + $0xc48] sm:$0xff]  ;;  %v979_v20 = vmin.f32 %v947_v8, %v524_v1  ;;  %v1233_v21 = vmin.f32 %v1201_v12, %v484_v6  ;;  %v498_v25 = vld [vmem:[#allocation3 + $0xd90] sm:$0xff]  ;;  %v447_v26 = vld [vmem:[#allocation3 + $0xbf8] sm:$0xff] }
  0x98   :  { %v1104_v22 = vmin.f32 %v1072_v13, %v456_v7  ;;  %v497_v24 = vld [vmem:[#allocation3 + $0xd88] sm:$0xff]  ;;  %v1390_v28 = vmin.f32 %v1358_v16, %v417_v10  ;;  %v486_v29 = vld [vmem:[#allocation3 + $0xd30] sm:$0xff]  ;;  %v419_v33 = vld [vmem:[#allocation3 + $0xb18] sm:$0xff] }
  0x99   :  { %v1519_v27 = vmin.f32 %v1487_v15, %v445_v3  ;;  %v458_v30 = vld [vmem:[#allocation3 + $0xc50] sm:$0xff]  ;;  %v1011_v31 = vmin.f32 %v979_v20, %v525_v14  ;;  %v882_v32 = vmin.f32 %v496_v23, %v497_v24  ;;  %v1265_v34 = vmin.f32 %v1233_v21, %v485_v17  ;;  %v527_v36 = vld [vmem:[#allocation3 + $0xe78] sm:$0xff]  ;;  %v420_v44 = vld [vmem:[#allocation3 + $0xb20] sm:$0xff] }
  0x9a   :  { %v1136_v35 = vmin.f32 %v1104_v22, %v457_v18  ;;  %v499_v37 = vld [vmem:[#allocation3 + $0xd98] sm:$0xff]  ;;  %v1422_v39 = vmin.f32 %v1390_v28, %v418_v11  ;;  %v528_v47 = vld [vmem:[#allocation3 + $0xe80] sm:$0xff]  ;;  %v421_v50 = vld [vmem:[#allocation3 + $0xb28] sm:$0xff] }
  0x9b   :  { %v1551_v38 = vmin.f32 %v1519_v27, %v446_v9  ;;  %v487_v40 = vld [vmem:[#allocation3 + $0xd38] sm:$0xff]  ;;  %v1043_v42 = vmin.f32 %v1011_v31, %v526_v19  ;;  %v914_v43 = vmin.f32 %v882_v32, %v498_v25  ;;  %v1297_v45 = vmin.f32 %v1265_v34, %v486_v29  ;;  %v500_v48 = vld [vmem:[#allocation3 + $0xda0] sm:$0xff]  ;;  %v422_v56 = vld [vmem:[#allocation3 + $0xb30] sm:$0xff] }
  0x9c   :  { %v459_v41 = vld [vmem:[#allocation3 + $0xc58] sm:$0xff]  ;;  %v1168_v46 = vmin.f32 %v1136_v35, %v458_v30  ;;  %v1454_v51 = vmin.f32 %v1422_v39, %v419_v33  ;;  %v488_v52 = vld [vmem:[#allocation3 + $0xd40] sm:$0xff]  ;;  %v489_v57 = vld [vmem:[#allocation3 + $0xd48] sm:$0xff] }
  0x9d   :  { %v1583_v49 = vmin.f32 %v1551_v38, %v447_v26  ;;  %v460_v53 = vld [vmem:[#allocation3 + $0xc60] sm:$0xff]  ;;  %v1075_v54 = vmin.f32 %v1043_v42, %v527_v36  ;;  %v946_v55 = vmin.f32 %v914_v43, %v499_v37  ;;  %v1329_v58 = vmin.f32 %v1297_v45, %v487_v40  ;;  %v529_v60 = vld [vmem:[#allocation3 + $0xe88] sm:$0xff]  ;;  %v530_v0 = vld [vmem:[#allocation3 + $0xe90] sm:$0xff] }
  0x9e   :  { %v1200_v59 = vmin.f32 %v1168_v46, %v459_v41  ;;  %v501_v61 = vld [vmem:[#allocation3 + $0xda8] sm:$0xff]  ;;  %v1486_v62 = vmin.f32 %v1454_v51, %v420_v44  ;;  %v502_v2 = vld [vmem:[#allocation3 + $0xdb0] sm:$0xff]  ;;  %v568_v6 = vld [vmem:[#allocation3 + $0xfc0] sm:$0xff] }
  0x9f   :  { %1729 = vmin.xlane.f32.xlu1 %v1583_v49  ;;  %v461_v63 = vld [vmem:[#allocation3 + $0xc68] sm:$0xff]  ;;  %v1107_v1 = vmin.f32 %v1075_v54, %v528_v47  ;;  %v978_v3 = vmin.f32 %v946_v55, %v500_v48  ;;  %v1361_v4 = vmin.f32 %v1329_v58, %v488_v52  ;;  %v570_v8 = vld [vmem:[#allocation3 + $0xfd0] sm:$0xff]  ;;  %v423_v9 = vld [vmem:[#allocation3 + $0xb38] sm:$0xff] }
  0xa0   :  { %v1232_v5 = vmin.f32 %v1200_v59, %v460_v53  ;;  %v569_v7 = vld [vmem:[#allocation3 + $0xfc8] sm:$0xff]  ;;  %v1518_v10 = vmin.f32 %v1486_v62, %v421_v50  ;;  %v490_v11 = vld [vmem:[#allocation3 + $0xd50] sm:$0xff]  ;;  %v531_v18 = vld [vmem:[#allocation3 + $0xe98] sm:$0xff] }
  0xa1   :  { %v462_v12 = vld [vmem:[#allocation3 + $0xc70] sm:$0xff]  ;;  %v1139_v13 = vmin.f32 %v1107_v1, %v529_v60  ;;  %v1010_v14 = vmin.f32 %v978_v3, %v501_v61  ;;  %v885_v15 = vmin.f32 %v568_v6, %v569_v7  ;;  %v1393_v16 = vmin.f32 %v1361_v4, %v489_v57  ;;  %v503_v19 = vld [vmem:[#allocation3 + $0xdb8] sm:$0xff]  ;;  %v492_v23 = vld [vmem:[#allocation3 + $0xd60] sm:$0xff] }
  0xa2   :  { %v1264_v17 = vmin.f32 %v1232_v5, %v461_v63  ;;  %v571_v20 = vld [vmem:[#allocation3 + $0xfd8] sm:$0xff]  ;;  %v1550_v21 = vmin.f32 %v1518_v10, %v422_v56  ;;  %v532_v30 = vld [vmem:[#allocation3 + $0xea0] sm:$0xff]  ;;  %v493_v34 = vld [vmem:[#allocation3 + $0xd68] sm:$0xff] }
  0xa3   :  { %v491_v22 = vld [vmem:[#allocation3 + $0xd58] sm:$0xff]  ;;  %v1171_v25 = vmin.f32 %v1139_v13, %v530_v0  ;;  %v1042_v26 = vmin.f32 %v1010_v14, %v502_v2  ;;  %v917_v27 = vmin.f32 %v885_v15, %v570_v8  ;;  %v1425_v28 = vmin.f32 %v1393_v16, %v490_v11  ;;  %v504_v31 = vld [vmem:[#allocation3 + $0xdc0] sm:$0xff]  ;;  %v465_v36 = vld [vmem:[#allocation3 + $0xc88] sm:$0xff] }
  0xa4   :  { %v463_v24 = vld [vmem:[#allocation3 + $0xc78] sm:$0xff]  ;;  %v1296_v29 = vmin.f32 %v1264_v17, %v462_v12  ;;  %v572_v32 = vld [vmem:[#allocation3 + $0xfe0] sm:$0xff]  ;;  %v1582_v33 = vmin.f32 %v1550_v21, %v423_v9  ;;  %v533_v42 = vld [vmem:[#allocation3 + $0xea8] sm:$0xff] }
  0xa5   :  { %v464_v35 = vld [vmem:[#allocation3 + $0xc80] sm:$0xff]  ;;  %v1203_v37 = vmin.f32 %v1171_v25, %v531_v18  ;;  %v1074_v38 = vmin.f32 %v1042_v26, %v503_v19  ;;  %v949_v39 = vmin.f32 %v917_v27, %v571_v20  ;;  %v1457_v40 = vmin.f32 %v1425_v28, %v491_v22  ;;  %v505_v43 = vld [vmem:[#allocation3 + $0xdc8] sm:$0xff]  ;;  %v534_v45 = vld [vmem:[#allocation3 + $0xeb0] sm:$0xff] }
  0xa6   :  { %v1328_v41 = vmin.f32 %v1296_v29, %v463_v24  ;;  %v573_v44 = vld [vmem:[#allocation3 + $0xfe8] sm:$0xff]  ;;  %1727 = vmin.xlane.f32.xlu0 %v1582_v33  ;;  %v506_v47 = vld [vmem:[#allocation3 + $0xdd0] sm:$0xff]  ;;  %v544_v53 = vld [vmem:[#allocation3 + $0xf00] sm:$0xff] }
  0xa7   :  { %v1235_v46 = vmin.f32 %v1203_v37, %v532_v30  ;;  %v1106_v48 = vmin.f32 %v1074_v38, %v504_v31  ;;  %v574_v49 = vld [vmem:[#allocation3 + $0xff0] sm:$0xff]  ;;  %v981_v50 = vmin.f32 %v949_v39, %v572_v32  ;;  %v1489_v51 = vmin.f32 %v1457_v40, %v492_v23  ;;  %v545_v54 = vld [vmem:[#allocation3 + $0xf08] sm:$0xff]  ;;  %v535_v58 = vld [vmem:[#allocation3 + $0xeb8] sm:$0xff] }
  0xa8   :  { %v1360_v52 = vmin.f32 %v1328_v41, %v464_v35  ;;  %v546_v55 = vld [vmem:[#allocation3 + $0xf10] sm:$0xff]  ;;  %v884_v62 = vmin.f32 %v544_v53, %v545_v54  ;;  %v507_v1 = vld [vmem:[#allocation3 + $0xdd8] sm:$0xff]  ;;  %v536_v6 = vld [vmem:[#allocation3 + $0xec0] sm:$0xff] }
  0xa9   :  { %v494_v56 = vld [vmem:[#allocation3 + $0xd70] sm:$0xff]  ;;  %v1267_v59 = vmin.f32 %v1235_v46, %v533_v42  ;;  %v1138_v60 = vmin.f32 %v1106_v48, %v505_v43  ;;  %v1013_v61 = vmin.f32 %v981_v50, %v573_v44  ;;  %v1521_v63 = vmin.f32 %v1489_v51, %v493_v34  ;;  %v575_v2 = vld [vmem:[#allocation3 + $0xff8] sm:$0xff]  ;;  %v508_v13 = vld [vmem:[#allocation3 + $0xde0] sm:$0xff] }
  0xaa   :  { %v466_v57 = vld [vmem:[#allocation3 + $0xc90] sm:$0xff]  ;;  %v1392_v0 = vmin.f32 %v1360_v52, %v465_v36  ;;  %v547_v3 = vld [vmem:[#allocation3 + $0xf18] sm:$0xff]  ;;  %v916_v10 = vmin.f32 %v884_v62, %v546_v55  ;;  %v576_v14 = vld [vmem:[#allocation3 + $0x1000] sm:$0xff] }
  0xab   :  { %v495_v4 = vld [vmem:[#allocation3 + $0xd78] sm:$0xff]  ;;  %v1299_v7 = vmin.f32 %v1267_v59, %v534_v45  ;;  %v1170_v8 = vmin.f32 %v1138_v60, %v506_v47  ;;  %v1045_v9 = vmin.f32 %v1013_v61, %v574_v49  ;;  %v1553_v11 = vmin.f32 %v1521_v63, %v494_v56  ;;  %v548_v15 = vld [vmem:[#allocation3 + $0xf20] sm:$0xff]  ;;  %v469_v17 = vld [vmem:[#allocation3 + $0xca8] sm:$0xff] }
  0xac   :  { %v467_v5 = vld [vmem:[#allocation3 + $0xc98] sm:$0xff]  ;;  %v1424_v12 = vmin.f32 %v1392_v0, %v466_v57  ;;  %v468_v16 = vld [vmem:[#allocation3 + $0xca0] sm:$0xff]  ;;  %v537_v18 = vld [vmem:[#allocation3 + $0xec8] sm:$0xff]  ;;  %v948_v22 = vmin.f32 %v916_v10, %v547_v3 }
  0xad   :  { %v1331_v19 = vmin.f32 %v1299_v7, %v535_v58  ;;  %v1202_v20 = vmin.f32 %v1170_v8, %v507_v1  ;;  %v1077_v21 = vmin.f32 %v1045_v9, %v575_v2  ;;  %v1585_v23 = vmin.f32 %v1553_v11, %v495_v4  ;;  %v509_v25 = vld [vmem:[#allocation3 + $0xde8] sm:$0xff]  ;;  %v538_v28 = vld [vmem:[#allocation3 + $0xed0] sm:$0xff]  ;;  %v616_v37 = vld [vmem:[#allocation3 + $0x1140] sm:$0xff] }
  0xae   :  { %v1456_v24 = vmin.f32 %v1424_v12, %v467_v5  ;;  %v577_v26 = vld [vmem:[#allocation3 + $0x1008] sm:$0xff]  ;;  %v510_v30 = vld [vmem:[#allocation3 + $0xdf0] sm:$0xff]  ;;  %v980_v34 = vmin.f32 %v948_v22, %v548_v15  ;;  %v539_v40 = vld [vmem:[#allocation3 + $0xed8] sm:$0xff] }
  0xaf   :  { %v549_v27 = vld [vmem:[#allocation3 + $0xf28] sm:$0xff]  ;;  %v1363_v29 = vmin.f32 %v1331_v19, %v536_v6  ;;  %v1234_v31 = vmin.f32 %v1202_v20, %v508_v13  ;;  %v578_v32 = vld [vmem:[#allocation3 + $0x1010] sm:$0xff]  ;;  %v1109_v33 = vmin.f32 %v1077_v21, %v576_v14  ;;  %1733 = vmin.xlane.f32.xlu1 %v1585_v23  ;;  %v511_v47 = vld [vmem:[#allocation3 + $0xdf8] sm:$0xff] }
  0xb0   :  { %v1488_v35 = vmin.f32 %v1456_v24, %v468_v16  ;;  %v550_v36 = vld [vmem:[#allocation3 + $0xf30] sm:$0xff]  ;;  %v617_v38 = vld [vmem:[#allocation3 + $0x1148] sm:$0xff]  ;;  %v1012_v44 = vmin.f32 %v980_v34, %v549_v27  ;;  %v579_v48 = vld [vmem:[#allocation3 + $0x1018] sm:$0xff] }
  0xb1   :  { %v470_v39 = vld [vmem:[#allocation3 + $0xcb0] sm:$0xff]  ;;  %v1395_v41 = vmin.f32 %v1363_v29, %v537_v18  ;;  %v1266_v42 = vmin.f32 %v1234_v31, %v509_v25  ;;  %v1141_v43 = vmin.f32 %v1109_v33, %v577_v26  ;;  %v551_v49 = vld [vmem:[#allocation3 + $0xf38] sm:$0xff]  ;;  %v887_v50 = vmin.f32 %v616_v37, %v617_v38  ;;  %v540_v52 = vld [vmem:[#allocation3 + $0xee0] sm:$0xff] }
  0xb2   :  { %v618_v45 = vld [vmem:[#allocation3 + $0x1150] sm:$0xff]  ;;  %v1520_v46 = vmin.f32 %v1488_v35, %v469_v17  ;;  %v471_v51 = vld [vmem:[#allocation3 + $0xcb8] sm:$0xff]  ;;  %v1044_v56 = vmin.f32 %v1012_v44, %v550_v36  ;;  %v512_v59 = vld [vmem:[#allocation3 + $0xe00] sm:$0xff] }
  0xb3   :  { %v1427_v53 = vmin.f32 %v1395_v41, %v538_v28  ;;  %v1298_v54 = vmin.f32 %v1266_v42, %v510_v30  ;;  %v1173_v55 = vmin.f32 %v1141_v43, %v578_v32  ;;  %v619_v57 = vld [vmem:[#allocation3 + $0x1158] sm:$0xff]  ;;  %v580_v60 = vld [vmem:[#allocation3 + $0x1020] sm:$0xff]  ;;  %v919_v62 = vmin.f32 %v887_v50, %v618_v45  ;;  %v541_v63 = vld [vmem:[#allocation3 + $0xee8] sm:$0xff] }
  0xb4   :  { %v1552_v58 = vmin.f32 %v1520_v46, %v470_v39  ;;  %v552_v61 = vld [vmem:[#allocation3 + $0xf40] sm:$0xff]  ;;  %v1076_v3 = vmin.f32 %v1044_v56, %v551_v49  ;;  %v542_v6 = vld [vmem:[#allocation3 + $0xef0] sm:$0xff]  ;;  %v513_v7 = vld [vmem:[#allocation3 + $0xe08] sm:$0xff] }
  0xb5   :  { %v1459_v0 = vmin.f32 %v1427_v53, %v539_v40  ;;  %v1330_v1 = vmin.f32 %v1298_v54, %v511_v47  ;;  %v1205_v2 = vmin.f32 %v1173_v55, %v579_v48  ;;  %v620_v4 = vld [vmem:[#allocation3 + $0x1160] sm:$0xff]  ;;  %v581_v8 = vld [vmem:[#allocation3 + $0x1028] sm:$0xff]  ;;  %v951_v10 = vmin.f32 %v919_v62, %v619_v57  ;;  %v514_v12 = vld [vmem:[#allocation3 + $0xe10] sm:$0xff] }
  0xb6   :  { %v1584_v5 = vmin.f32 %v1552_v58, %v471_v51  ;;  %v553_v9 = vld [vmem:[#allocation3 + $0xf48] sm:$0xff]  ;;  %v582_v14 = vld [vmem:[#allocation3 + $0x1030] sm:$0xff]  ;;  %v1108_v16 = vmin.f32 %v1076_v3, %v552_v61  ;;  %v592_v20 = vld [vmem:[#allocation3 + $0x1080] sm:$0xff] }
  0xb7   :  { %v1491_v11 = vmin.f32 %v1459_v0, %v540_v52  ;;  %v1362_v13 = vmin.f32 %v1330_v1, %v512_v59  ;;  %v1237_v15 = vmin.f32 %v1205_v2, %v580_v60  ;;  %v621_v17 = vld [vmem:[#allocation3 + $0x1168] sm:$0xff]  ;;  %v554_v18 = vld [vmem:[#allocation3 + $0xf50] sm:$0xff]  ;;  %v983_v19 = vmin.f32 %v951_v10, %v620_v4  ;;  %v543_v23 = vld [vmem:[#allocation3 + $0xef8] sm:$0xff] }
  0xb8   :  { %1731 = vmin.xlane.f32.xlu0 %v1584_v5  ;;  %v593_v21 = vld [vmem:[#allocation3 + $0x1088] sm:$0xff]  ;;  %v1140_v27 = vmin.f32 %v1108_v16, %v553_v9  ;;  %v622_v28 = vld [vmem:[#allocation3 + $0x1170] sm:$0xff]  ;;  %v515_v30 = vld [vmem:[#allocation3 + $0xe18] sm:$0xff] }
  0xb9   :  { %v1523_v24 = vmin.f32 %v1491_v11, %v541_v63  ;;  %v1394_v25 = vmin.f32 %v1362_v13, %v513_v7  ;;  %v1269_v26 = vmin.f32 %v1237_v15, %v581_v8  ;;  %v594_v29 = vld [vmem:[#allocation3 + $0x1090] sm:$0xff]  ;;  %v583_v31 = vld [vmem:[#allocation3 + $0x1038] sm:$0xff]  ;;  %v1015_v33 = vmin.f32 %v983_v19, %v621_v17  ;;  %v516_v41 = vld [vmem:[#allocation3 + $0xe20] sm:$0xff] }
  0xba   :  { %v555_v32 = vld [vmem:[#allocation3 + $0xf58] sm:$0xff]  ;;  %v886_v34 = vmin.f32 %v592_v20, %v593_v21  ;;  %v1172_v38 = vmin.f32 %v1140_v27, %v554_v18  ;;  %v584_v42 = vld [vmem:[#allocation3 + $0x1040] sm:$0xff]  ;;  %v517_v47 = vld [vmem:[#allocation3 + $0xe28] sm:$0xff] }
  0xbb   :  { %v1555_v35 = vmin.f32 %v1523_v24, %v542_v6  ;;  %v1426_v36 = vmin.f32 %v1394_v25, %v514_v12  ;;  %v1301_v37 = vmin.f32 %v1269_v26, %v582_v14  ;;  %v623_v39 = vld [vmem:[#allocation3 + $0x1178] sm:$0xff]  ;;  %v556_v43 = vld [vmem:[#allocation3 + $0xf60] sm:$0xff]  ;;  %v1047_v44 = vmin.f32 %v1015_v33, %v622_v28  ;;  %v518_v53 = vld [vmem:[#allocation3 + $0xe30] sm:$0xff] }
  0xbc   :  { %v595_v40 = vld [vmem:[#allocation3 + $0x1098] sm:$0xff]  ;;  %v918_v45 = vmin.f32 %v886_v34, %v594_v29  ;;  %v1204_v50 = vmin.f32 %v1172_v38, %v555_v32  ;;  %v624_v51 = vld [vmem:[#allocation3 + $0x1180] sm:$0xff]  ;;  %v585_v54 = vld [vmem:[#allocation3 + $0x1048] sm:$0xff] }
  0xbd   :  { %v1587_v46 = vmin.f32 %v1555_v35, %v543_v23  ;;  %v1458_v48 = vmin.f32 %v1426_v36, %v515_v30  ;;  %v1333_v49 = vmin.f32 %v1301_v37, %v583_v31  ;;  %v596_v52 = vld [vmem:[#allocation3 + $0x10a0] sm:$0xff]  ;;  %v586_v55 = vld [vmem:[#allocation3 + $0x1050] sm:$0xff]  ;;  %v557_v56 = vld [vmem:[#allocation3 + $0xf68] sm:$0xff]  ;;  %v1079_v57 = vmin.f32 %v1047_v44, %v623_v39 }
  0xbe   :  { %v950_v58 = vmin.f32 %v918_v45, %v595_v40  ;;  %v558_v61 = vld [vmem:[#allocation3 + $0xf70] sm:$0xff]  ;;  %v1236_v62 = vmin.f32 %v1204_v50, %v556_v43  ;;  %v625_v63 = vld [vmem:[#allocation3 + $0x1188] sm:$0xff]  ;;  %v664_v3 = vld [vmem:[#allocation3 + $0x12c0] sm:$0xff] }
  0xbf   :  { %1737 = vmin.xlane.f32.xlu1 %v1587_v46  ;;  %v1490_v59 = vmin.f32 %v1458_v48, %v516_v41  ;;  %v1365_v60 = vmin.f32 %v1333_v49, %v584_v42  ;;  %v597_v0 = vld [vmem:[#allocation3 + $0x10a8] sm:$0xff]  ;;  %v1111_v1 = vmin.f32 %v1079_v57, %v624_v51  ;;  %v666_v5 = vld [vmem:[#allocation3 + $0x12d0] sm:$0xff]  ;;  %v519_v7 = vld [vmem:[#allocation3 + $0xe38] sm:$0xff] }
  0xc0   :  { %v982_v2 = vmin.f32 %v950_v58, %v596_v52  ;;  %v665_v4 = vld [vmem:[#allocation3 + $0x12c8] sm:$0xff]  ;;  %v1268_v10 = vmin.f32 %v1236_v62, %v557_v56  ;;  %v626_v11 = vld [vmem:[#allocation3 + $0x1190] sm:$0xff]  ;;  %v587_v14 = vld [vmem:[#allocation3 + $0x1058] sm:$0xff] }
  0xc1   :  { %v1522_v8 = vmin.f32 %v1490_v59, %v517_v47  ;;  %v1397_v9 = vmin.f32 %v1365_v60, %v585_v54  ;;  %v598_v12 = vld [vmem:[#allocation3 + $0x10b0] sm:$0xff]  ;;  %v889_v13 = vmin.f32 %v664_v3, %v665_v4  ;;  %v559_v15 = vld [vmem:[#allocation3 + $0xf78] sm:$0xff]  ;;  %v1143_v16 = vmin.f32 %v1111_v1, %v625_v63  ;;  %v588_v25 = vld [vmem:[#allocation3 + $0x1060] sm:$0xff] }
  0xc2   :  { %v1014_v17 = vmin.f32 %v982_v2, %v597_v0  ;;  %v667_v18 = vld [vmem:[#allocation3 + $0x12d8] sm:$0xff]  ;;  %v1300_v21 = vmin.f32 %v1268_v10, %v558_v61  ;;  %v560_v26 = vld [vmem:[#allocation3 + $0xf80] sm:$0xff]  ;;  %v589_v31 = vld [vmem:[#allocation3 + $0x1068] sm:$0xff] }
  0xc3   :  { %v1554_v19 = vmin.f32 %v1522_v8, %v518_v53  ;;  %v1429_v20 = vmin.f32 %v1397_v9, %v586_v55  ;;  %v599_v23 = vld [vmem:[#allocation3 + $0x10b8] sm:$0xff]  ;;  %v921_v24 = vmin.f32 %v889_v13, %v666_v5  ;;  %v1175_v27 = vmin.f32 %v1143_v16, %v626_v11  ;;  %v668_v29 = vld [vmem:[#allocation3 + $0x12e0] sm:$0xff]  ;;  %v590_v37 = vld [vmem:[#allocation3 + $0x1070] sm:$0xff] }
  0xc4   :  { %v1046_v28 = vmin.f32 %v1014_v17, %v598_v12  ;;  %v1332_v33 = vmin.f32 %v1300_v21, %v559_v15  ;;  %v628_v34 = vld [vmem:[#allocation3 + $0x11a0] sm:$0xff]  ;;  %v561_v38 = vld [vmem:[#allocation3 + $0xf88] sm:$0xff]  ;;  %v562_v39 = vld [vmem:[#allocation3 + $0xf90] sm:$0xff] }
  0xc5   :  { %v1704_v22 = vpop.xlane.xlu1 %1703  ;;  %v1586_v30 = vmin.f32 %v1554_v19, %v519_v7  ;;  %v1461_v32 = vmin.f32 %v1429_v20, %v587_v14  ;;  %v600_v35 = vld [vmem:[#allocation3 + $0x10c0] sm:$0xff]  ;;  %v953_v36 = vmin.f32 %v921_v24, %v667_v18  ;;  %v669_v42 = vld [vmem:[#allocation3 + $0x12e8] sm:$0xff]  ;;  %v670_v47 = vld [vmem:[#allocation3 + $0x12f0] sm:$0xff] }
  0xc6   :  { %1766 = vst.msk [vmem:[%s1971_s1 + $0x10] sm:$0xff] %vm1763_vm0, %v1704_v22  ;;  %v627_v22 = vld [vmem:[#allocation3 + $0x1198] sm:$0xff]  ;;  %v1078_v41 = vmin.f32 %v1046_v28, %v599_v23  ;;  %v1364_v44 = vmin.f32 %v1332_v33, %v560_v26  ;;  %v629_v45 = vld [vmem:[#allocation3 + $0x11a8] sm:$0xff]  ;;  %v640_v51 = vld [vmem:[#allocation3 + $0x1200] sm:$0xff] }
  0xc7   :  { %v1207_v40 = vmin.f32 %v1175_v27, %v627_v22  ;;  %1735 = vmin.xlane.f32.xlu0 %v1586_v30  ;;  %v1493_v43 = vmin.f32 %v1461_v32, %v588_v25  ;;  %v601_v46 = vld [vmem:[#allocation3 + $0x10c8] sm:$0xff]  ;;  %v985_v48 = vmin.f32 %v953_v36, %v668_v29  ;;  %v642_v53 = vld [vmem:[#allocation3 + $0x1210] sm:$0xff]  ;;  %v591_v55 = vld [vmem:[#allocation3 + $0x1078] sm:$0xff] }
  0xc8   :  { %v1700_v6 = vpop.xlane.xlu0 %1699  ;;  %v1110_v50 = vmin.f32 %v1078_v41, %v600_v35  ;;  %v641_v52 = vld [vmem:[#allocation3 + $0x1208] sm:$0xff]  ;;  %v1396_v57 = vmin.f32 %v1364_v44, %v561_v38  ;;  %v630_v58 = vld [vmem:[#allocation3 + $0x11b0] sm:$0xff]  ;;  %v563_v62 = vld [vmem:[#allocation3 + $0xf98] sm:$0xff] }
  0xc9   :  { %1764 = vst.msk [vmem:[%s1971_s1] sm:$0xff] %vm1763_vm0, %v1700_v6  ;;  %v1239_v49 = vmin.f32 %v1207_v40, %v628_v34  ;;  %v1525_v56 = vmin.f32 %v1493_v43, %v589_v31  ;;  %v602_v59 = vld [vmem:[#allocation3 + $0x10d0] sm:$0xff]  ;;  %v1017_v60 = vmin.f32 %v985_v48, %v669_v42  ;;  %v888_v61 = vmin.f32 %v640_v51, %v641_v52  ;;  %v671_v1 = vld [vmem:[#allocation3 + $0x12f8] sm:$0xff]  ;;  %v564_v9 = vld [vmem:[#allocation3 + $0xfa0] sm:$0xff] }
  0xca   :  { %v1142_v0 = vmin.f32 %v1110_v50, %v601_v46  ;;  %v643_v2 = vld [vmem:[#allocation3 + $0x1218] sm:$0xff]  ;;  %v1428_v4 = vmin.f32 %v1396_v57, %v562_v39  ;;  %v672_v12 = vld [vmem:[#allocation3 + $0x1300] sm:$0xff]  ;;  %v565_v15 = vld [vmem:[#allocation3 + $0xfa8] sm:$0xff] }
  0xcb   :  { %v1271_v63 = vmin.f32 %v1239_v49, %v629_v45  ;;  %v1557_v3 = vmin.f32 %v1525_v56, %v590_v37  ;;  %v631_v5 = vld [vmem:[#allocation3 + $0x11b8] sm:$0xff]  ;;  %v1049_v7 = vmin.f32 %v1017_v60, %v670_v47  ;;  %v920_v8 = vmin.f32 %v888_v61, %v642_v53  ;;  %v644_v13 = vld [vmem:[#allocation3 + $0x1220] sm:$0xff]  ;;  %v566_v21 = vld [vmem:[#allocation3 + $0xfb0] sm:$0xff] }
  0xcc   :  { %v1706_v54 = vpop.xlane.xlu1 %1705  ;;  %v603_v6 = vld [vmem:[#allocation3 + $0x10d8] sm:$0xff]  ;;  %v1174_v11 = vmin.f32 %v1142_v0, %v602_v59  ;;  %v1460_v16 = vmin.f32 %v1428_v4, %v563_v62  ;;  %v632_v17 = vld [vmem:[#allocation3 + $0x11c0] sm:$0xff]  ;;  %v633_v22 = vld [vmem:[#allocation3 + $0x11c8] sm:$0xff] }
  0xcd   :  { %1767 = vst.msk [vmem:[%s1971_s1 + $0x18] sm:$0xff] %vm1763_vm0, %v1706_v54  ;;  %v1303_v10 = vmin.f32 %v1271_v63, %v630_v58  ;;  %v1589_v14 = vmin.f32 %v1557_v3, %v591_v55  ;;  %v604_v18 = vld [vmem:[#allocation3 + $0x10e0] sm:$0xff]  ;;  %v1081_v19 = vmin.f32 %v1049_v7, %v671_v1  ;;  %v952_v20 = vmin.f32 %v920_v8, %v643_v2  ;;  %v673_v25 = vld [vmem:[#allocation3 + $0x1308] sm:$0xff]  ;;  %v674_v29 = vld [vmem:[#allocation3 + $0x1310] sm:$0xff] }
  0xce   :  { %v1206_v24 = vmin.f32 %v1174_v11, %v603_v6  ;;  %v645_v26 = vld [vmem:[#allocation3 + $0x1228] sm:$0xff]  ;;  %v1492_v27 = vmin.f32 %v1460_v16, %v564_v9  ;;  %v646_v31 = vld [vmem:[#allocation3 + $0x1230] sm:$0xff]  ;;  %v712_v35 = vld [vmem:[#allocation3 + $0x1440] sm:$0xff] }
  0xcf   :  { %v1335_v23 = vmin.f32 %v1303_v10, %v631_v5  ;;  %1741 = vmin.xlane.f32.xlu1 %v1589_v14  ;;  %v605_v28 = vld [vmem:[#allocation3 + $0x10e8] sm:$0xff]  ;;  %v1113_v30 = vmin.f32 %v1081_v19, %v672_v12  ;;  %v984_v32 = vmin.f32 %v952_v20, %v644_v13  ;;  %v714_v37 = vld [vmem:[#allocation3 + $0x1450] sm:$0xff]  ;;  %v567_v39 = vld [vmem:[#allocation3 + $0xfb8] sm:$0xff] }
  0xd0   :  { %v1238_v34 = vmin.f32 %v1206_v24, %v604_v18  ;;  %v713_v36 = vld [vmem:[#allocation3 + $0x1448] sm:$0xff]  ;;  %v1524_v40 = vmin.f32 %v1492_v27, %v565_v15  ;;  %v634_v41 = vld [vmem:[#allocation3 + $0x11d0] sm:$0xff]  ;;  %v675_v48 = vld [vmem:[#allocation3 + $0x1318] sm:$0xff] }
  0xd1   :  { %v1367_v33 = vmin.f32 %v1335_v23, %v632_v17  ;;  %v606_v42 = vld [vmem:[#allocation3 + $0x10f0] sm:$0xff]  ;;  %v1145_v43 = vmin.f32 %v1113_v30, %v673_v25  ;;  %v1016_v44 = vmin.f32 %v984_v32, %v645_v26  ;;  %v891_v45 = vmin.f32 %v712_v35, %v713_v36  ;;  %v647_v49 = vld [vmem:[#allocation3 + $0x1238] sm:$0xff]  ;;  %v636_v53 = vld [vmem:[#allocation3 + $0x11e0] sm:$0xff] }
  0xd2   :  { %v1270_v47 = vmin.f32 %v1238_v34, %v605_v28  ;;  %v715_v50 = vld [vmem:[#allocation3 + $0x1458] sm:$0xff]  ;;  %v1556_v51 = vmin.f32 %v1524_v40, %v566_v21  ;;  %v676_v60 = vld [vmem:[#allocation3 + $0x1320] sm:$0xff]  ;;  %v637_v0 = vld [vmem:[#allocation3 + $0x11e8] sm:$0xff] }
  0xd3   :  { %v1399_v46 = vmin.f32 %v1367_v33, %v633_v22  ;;  %v635_v52 = vld [vmem:[#allocation3 + $0x11d8] sm:$0xff]  ;;  %v1177_v55 = vmin.f32 %v1145_v43, %v674_v29  ;;  %v1048_v56 = vmin.f32 %v1016_v44, %v646_v31  ;;  %v923_v57 = vmin.f32 %v891_v45, %v714_v37  ;;  %v648_v61 = vld [vmem:[#allocation3 + $0x1240] sm:$0xff]  ;;  %v609_v2 = vld [vmem:[#allocation3 + $0x1108] sm:$0xff] }
  0xd4   :  { %v607_v54 = vld [vmem:[#allocation3 + $0x10f8] sm:$0xff]  ;;  %v1302_v59 = vmin.f32 %v1270_v47, %v606_v42  ;;  %v716_v62 = vld [vmem:[#allocation3 + $0x1460] sm:$0xff]  ;;  %v1588_v63 = vmin.f32 %v1556_v51, %v567_v39  ;;  %v677_v8 = vld [vmem:[#allocation3 + $0x1328] sm:$0xff] }
  0xd5   :  { %v1431_v58 = vmin.f32 %v1399_v46, %v634_v41  ;;  %v608_v1 = vld [vmem:[#allocation3 + $0x1100] sm:$0xff]  ;;  %v1209_v3 = vmin.f32 %v1177_v55, %v675_v48  ;;  %v1080_v4 = vmin.f32 %v1048_v56, %v647_v49  ;;  %v955_v5 = vmin.f32 %v923_v57, %v715_v50  ;;  %v649_v9 = vld [vmem:[#allocation3 + $0x1248] sm:$0xff]  ;;  %v678_v11 = vld [vmem:[#allocation3 + $0x1330] sm:$0xff] }
  0xd6   :  { %v1702_v38 = vpop.xlane.xlu0 %1701  ;;  %v1334_v7 = vmin.f32 %v1302_v59, %v607_v54  ;;  %v717_v10 = vld [vmem:[#allocation3 + $0x1468] sm:$0xff]  ;;  %1739 = vmin.xlane.f32.xlu0 %v1588_v63  ;;  %v650_v13 = vld [vmem:[#allocation3 + $0x1250] sm:$0xff]  ;;  %v688_v19 = vld [vmem:[#allocation3 + $0x1380] sm:$0xff] }
  0xd7   :  { %1765 = vst.msk [vmem:[%s1971_s1 + $0x8] sm:$0xff] %vm1763_vm0, %v1702_v38  ;;  %v1463_v6 = vmin.f32 %v1431_v58, %v635_v52  ;;  %v1241_v12 = vmin.f32 %v1209_v3, %v676_v60  ;;  %v1112_v14 = vmin.f32 %v1080_v4, %v648_v61  ;;  %v718_v15 = vld [vmem:[#allocation3 + $0x1470] sm:$0xff]  ;;  %v987_v16 = vmin.f32 %v955_v5, %v716_v62  ;;  %v689_v20 = vld [vmem:[#allocation3 + $0x1388] sm:$0xff]  ;;  %v679_v24 = vld [vmem:[#allocation3 + $0x1338] sm:$0xff] }
  0xd8   :  { %v1366_v18 = vmin.f32 %v1334_v7, %v608_v1  ;;  %v690_v21 = vld [vmem:[#allocation3 + $0x1390] sm:$0xff]  ;;  %v890_v28 = vmin.f32 %v688_v19, %v689_v20  ;;  %v651_v32 = vld [vmem:[#allocation3 + $0x1258] sm:$0xff]  ;;  %v680_v37 = vld [vmem:[#allocation3 + $0x1340] sm:$0xff] }
  0xd9   :  { %v1495_v17 = vmin.f32 %v1463_v6, %v636_v53  ;;  %v638_v22 = vld [vmem:[#allocation3 + $0x11f0] sm:$0xff]  ;;  %v1273_v25 = vmin.f32 %v1241_v12, %v677_v8  ;;  %v1144_v26 = vmin.f32 %v1112_v14, %v649_v9  ;;  %v1019_v27 = vmin.f32 %v987_v16, %v717_v10  ;;  %v719_v33 = vld [vmem:[#allocation3 + $0x1478] sm:$0xff]  ;;  %v652_v44 = vld [vmem:[#allocation3 + $0x1260] sm:$0xff] }
  0xda   :  { %v610_v23 = vld [vmem:[#allocation3 + $0x1110] sm:$0xff]  ;;  %v1398_v31 = vmin.f32 %v1366_v18, %v609_v2  ;;  %v691_v34 = vld [vmem:[#allocation3 + $0x1398] sm:$0xff]  ;;  %v922_v41 = vmin.f32 %v890_v28, %v690_v21  ;;  %v720_v45 = vld [vmem:[#allocation3 + $0x1480] sm:$0xff] }
  0xdb   :  { %v1527_v30 = vmin.f32 %v1495_v17, %v637_v0  ;;  %v639_v35 = vld [vmem:[#allocation3 + $0x11f8] sm:$0xff]  ;;  %v1305_v38 = vmin.f32 %v1273_v25, %v678_v11  ;;  %v1176_v39 = vmin.f32 %v1144_v26, %v650_v13  ;;  %v1051_v40 = vmin.f32 %v1019_v27, %v718_v15  ;;  %v692_v46 = vld [vmem:[#allocation3 + $0x13a0] sm:$0xff]  ;;  %v613_v48 = vld [vmem:[#allocation3 + $0x1128] sm:$0xff] }
  0xdc   :  { %v611_v36 = vld [vmem:[#allocation3 + $0x1118] sm:$0xff]  ;;  %v1430_v43 = vmin.f32 %v1398_v31, %v610_v23  ;;  %v612_v47 = vld [vmem:[#allocation3 + $0x1120] sm:$0xff]  ;;  %v681_v49 = vld [vmem:[#allocation3 + $0x1348] sm:$0xff]  ;;  %v954_v53 = vmin.f32 %v922_v41, %v691_v34 }
  0xdd   :  { %v1559_v42 = vmin.f32 %v1527_v30, %v638_v22  ;;  %v1337_v50 = vmin.f32 %v1305_v38, %v679_v24  ;;  %v1208_v51 = vmin.f32 %v1176_v39, %v651_v32  ;;  %v1083_v52 = vmin.f32 %v1051_v40, %v719_v33  ;;  %v653_v56 = vld [vmem:[#allocation3 + $0x1268] sm:$0xff]  ;;  %v682_v59 = vld [vmem:[#allocation3 + $0x1350] sm:$0xff]  ;;  %v760_v4 = vld [vmem:[#allocation3 + $0x15c0] sm:$0xff] }
  0xde   :  { %v1462_v55 = vmin.f32 %v1430_v43, %v611_v36  ;;  %v721_v57 = vld [vmem:[#allocation3 + $0x1488] sm:$0xff]  ;;  %v654_v61 = vld [vmem:[#allocation3 + $0x1270] sm:$0xff]  ;;  %v986_v1 = vmin.f32 %v954_v53, %v692_v46  ;;  %v683_v7 = vld [vmem:[#allocation3 + $0x1358] sm:$0xff] }
  0xdf   :  { %v1710_v29 = vpop.xlane.xlu1 %1709  ;;  %v1591_v54 = vmin.f32 %v1559_v42, %v639_v35  ;;  %v693_v58 = vld [vmem:[#allocation3 + $0x13a8] sm:$0xff]  ;;  %v1369_v60 = vmin.f32 %v1337_v50, %v680_v37  ;;  %v1240_v62 = vmin.f32 %v1208_v51, %v652_v44  ;;  %v722_v63 = vld [vmem:[#allocation3 + $0x1490] sm:$0xff]  ;;  %v1115_v0 = vmin.f32 %v1083_v52, %v720_v45  ;;  %v655_v15 = vld [vmem:[#allocation3 + $0x1278] sm:$0xff] }
  0xe0   :  { %1769 = vst.msk [vmem:[%s1971_s1 + $0x28] sm:$0xff] %vm1763_vm0, %v1710_v29  ;;  %v1494_v2 = vmin.f32 %v1462_v55, %v612_v47  ;;  %v694_v3 = vld [vmem:[#allocation3 + $0x13b0] sm:$0xff]  ;;  %v761_v5 = vld [vmem:[#allocation3 + $0x15c8] sm:$0xff]  ;;  %v1018_v11 = vmin.f32 %v986_v1, %v693_v58  ;;  %v723_v16 = vld [vmem:[#allocation3 + $0x1498] sm:$0xff] }
  0xe1   :  { %1745 = vmin.xlane.f32.xlu1 %v1591_v54  ;;  %v614_v6 = vld [vmem:[#allocation3 + $0x1130] sm:$0xff]  ;;  %v1401_v8 = vmin.f32 %v1369_v60, %v681_v49  ;;  %v1272_v9 = vmin.f32 %v1240_v62, %v653_v56  ;;  %v1147_v10 = vmin.f32 %v1115_v0, %v721_v57  ;;  %v695_v17 = vld [vmem:[#allocation3 + $0x13b8] sm:$0xff]  ;;  %v893_v18 = vmin.f32 %v760_v4, %v761_v5  ;;  %v684_v20 = vld [vmem:[#allocation3 + $0x1360] sm:$0xff] }
  0xe2   :  { %v762_v12 = vld [vmem:[#allocation3 + $0x15d0] sm:$0xff]  ;;  %v1526_v14 = vmin.f32 %v1494_v2, %v613_v48  ;;  %v615_v19 = vld [vmem:[#allocation3 + $0x1138] sm:$0xff]  ;;  %v1050_v24 = vmin.f32 %v1018_v11, %v694_v3  ;;  %v656_v27 = vld [vmem:[#allocation3 + $0x1280] sm:$0xff] }
  0xe3   :  { %v1433_v21 = vmin.f32 %v1401_v8, %v682_v59  ;;  %v1304_v22 = vmin.f32 %v1272_v9, %v654_v61  ;;  %v1179_v23 = vmin.f32 %v1147_v10, %v722_v63  ;;  %v763_v25 = vld [vmem:[#allocation3 + $0x15d8] sm:$0xff]  ;;  %v724_v28 = vld [vmem:[#allocation3 + $0x14a0] sm:$0xff]  ;;  %v925_v30 = vmin.f32 %v893_v18, %v762_v12  ;;  %v685_v31 = vld [vmem:[#allocation3 + $0x1368] sm:$0xff] }
  0xe4   :  { %v1558_v26 = vmin.f32 %v1526_v14, %v614_v6  ;;  %v696_v29 = vld [vmem:[#allocation3 + $0x13c0] sm:$0xff]  ;;  %v1082_v35 = vmin.f32 %v1050_v24, %v695_v17  ;;  %v686_v38 = vld [vmem:[#allocation3 + $0x1370] sm:$0xff]  ;;  %v657_v39 = vld [vmem:[#allocation3 + $0x1288] sm:$0xff] }
  0xe5   :  { %v1465_v32 = vmin.f32 %v1433_v21, %v683_v7  ;;  %v1336_v33 = vmin.f32 %v1304_v22, %v655_v15  ;;  %v1211_v34 = vmin.f32 %v1179_v23, %v723_v16  ;;  %v764_v36 = vld [vmem:[#allocation3 + $0x15e0] sm:$0xff]  ;;  %v725_v40 = vld [vmem:[#allocation3 + $0x14a8] sm:$0xff]  ;;  %v957_v42 = vmin.f32 %v925_v30, %v763_v25  ;;  %v658_v44 = vld [vmem:[#allocation3 + $0x1290] sm:$0xff] }
  0xe6   :  { %v1590_v37 = vmin.f32 %v1558_v26, %v615_v19  ;;  %v697_v41 = vld [vmem:[#allocation3 + $0x13c8] sm:$0xff]  ;;  %v726_v46 = vld [vmem:[#allocation3 + $0x14b0] sm:$0xff]  ;;  %v1114_v48 = vmin.f32 %v1082_v35, %v696_v29  ;;  %v736_v52 = vld [vmem:[#allocation3 + $0x1500] sm:$0xff] }
  0xe7   :  { %v1708_v13 = vpop.xlane.xlu0 %1707  ;;  %v1497_v43 = vmin.f32 %v1465_v32, %v684_v20  ;;  %v1368_v45 = vmin.f32 %v1336_v33, %v656_v27  ;;  %v1243_v47 = vmin.f32 %v1211_v34, %v724_v28  ;;  %v765_v49 = vld [vmem:[#allocation3 + $0x15e8] sm:$0xff]  ;;  %v698_v50 = vld [vmem:[#allocation3 + $0x13d0] sm:$0xff]  ;;  %v989_v51 = vmin.f32 %v957_v42, %v764_v36  ;;  %v687_v55 = vld [vmem:[#allocation3 + $0x1378] sm:$0xff] }
  0xe8   :  { %1768 = vst.msk [vmem:[%s1971_s1 + $0x20] sm:$0xff] %vm1763_vm0, %v1708_v13  ;;  %1743 = vmin.xlane.f32.xlu0 %v1590_v37  ;;  %v737_v53 = vld [vmem:[#allocation3 + $0x1508] sm:$0xff]  ;;  %v1146_v59 = vmin.f32 %v1114_v48, %v697_v41  ;;  %v766_v60 = vld [vmem:[#allocation3 + $0x15f0] sm:$0xff]  ;;  %v659_v62 = vld [vmem:[#allocation3 + $0x1298] sm:$0xff] }
  0xe9   :  { %v1529_v56 = vmin.f32 %v1497_v43, %v685_v31  ;;  %v1400_v57 = vmin.f32 %v1368_v45, %v657_v39  ;;  %v1275_v58 = vmin.f32 %v1243_v47, %v725_v40  ;;  %v738_v61 = vld [vmem:[#allocation3 + $0x1510] sm:$0xff]  ;;  %v727_v63 = vld [vmem:[#allocation3 + $0x14b8] sm:$0xff]  ;;  %v1021_v1 = vmin.f32 %v989_v51, %v765_v49  ;;  %v660_v9 = vld [vmem:[#allocation3 + $0x12a0] sm:$0xff] }
  0xea   :  { %v699_v0 = vld [vmem:[#allocation3 + $0x13d8] sm:$0xff]  ;;  %v892_v2 = vmin.f32 %v736_v52, %v737_v53  ;;  %v1178_v6 = vmin.f32 %v1146_v59, %v698_v50  ;;  %v728_v10 = vld [vmem:[#allocation3 + $0x14c0] sm:$0xff]  ;;  %v661_v15 = vld [vmem:[#allocation3 + $0x12a8] sm:$0xff] }
  0xeb   :  { %v1561_v3 = vmin.f32 %v1529_v56, %v686_v38  ;;  %v1432_v4 = vmin.f32 %v1400_v57, %v658_v44  ;;  %v1307_v5 = vmin.f32 %v1275_v58, %v726_v46  ;;  %v767_v7 = vld [vmem:[#allocation3 + $0x15f8] sm:$0xff]  ;;  %v700_v11 = vld [vmem:[#allocation3 + $0x13e0] sm:$0xff]  ;;  %v1053_v12 = vmin.f32 %v1021_v1, %v766_v60  ;;  %v662_v21 = vld [vmem:[#allocation3 + $0x12b0] sm:$0xff] }
  0xec   :  { %v739_v8 = vld [vmem:[#allocation3 + $0x1518] sm:$0xff]  ;;  %v924_v13 = vmin.f32 %v892_v2, %v738_v61  ;;  %v1210_v18 = vmin.f32 %v1178_v6, %v699_v0  ;;  %v768_v19 = vld [vmem:[#allocation3 + $0x1600] sm:$0xff]  ;;  %v729_v22 = vld [vmem:[#allocation3 + $0x14c8] sm:$0xff] }
  0xed   :  { %v1593_v14 = vmin.f32 %v1561_v3, %v687_v55  ;;  %v1464_v16 = vmin.f32 %v1432_v4, %v659_v62  ;;  %v1339_v17 = vmin.f32 %v1307_v5, %v727_v63  ;;  %v740_v20 = vld [vmem:[#allocation3 + $0x1520] sm:$0xff]  ;;  %v730_v23 = vld [vmem:[#allocation3 + $0x14d0] sm:$0xff]  ;;  %v701_v24 = vld [vmem:[#allocation3 + $0x13e8] sm:$0xff]  ;;  %v1085_v25 = vmin.f32 %v1053_v12, %v767_v7 }
  0xee   :  { %v956_v26 = vmin.f32 %v924_v13, %v739_v8  ;;  %v702_v29 = vld [vmem:[#allocation3 + $0x13f0] sm:$0xff]  ;;  %v1242_v30 = vmin.f32 %v1210_v18, %v700_v11  ;;  %v769_v31 = vld [vmem:[#allocation3 + $0x1608] sm:$0xff]  ;;  %v808_v35 = vld [vmem:[#allocation3 + $0x1740] sm:$0xff] }
  0xef   :  { %v1714_v54 = vpop.xlane.xlu1 %1713  ;;  %1749 = vmin.xlane.f32.xlu1 %v1593_v14  ;;  %v1496_v27 = vmin.f32 %v1464_v16, %v660_v9  ;;  %v1371_v28 = vmin.f32 %v1339_v17, %v728_v10  ;;  %v741_v32 = vld [vmem:[#allocation3 + $0x1528] sm:$0xff]  ;;  %v1117_v33 = vmin.f32 %v1085_v25, %v768_v19  ;;  %v810_v37 = vld [vmem:[#allocation3 + $0x1750] sm:$0xff]  ;;  %v663_v39 = vld [vmem:[#allocation3 + $0x12b8] sm:$0xff] }
  0xf0   :  { %1771 = vst.msk [vmem:[%s1971_s1 + $0x38] sm:$0xff] %vm1763_vm0, %v1714_v54  ;;  %v988_v34 = vmin.f32 %v956_v26, %v740_v20  ;;  %v809_v36 = vld [vmem:[#allocation3 + $0x1748] sm:$0xff]  ;;  %v1274_v42 = vmin.f32 %v1242_v30, %v701_v24  ;;  %v770_v43 = vld [vmem:[#allocation3 + $0x1610] sm:$0xff]  ;;  %v731_v46 = vld [vmem:[#allocation3 + $0x14d8] sm:$0xff] }
  0xf1   :  { %v1528_v40 = vmin.f32 %v1496_v27, %v661_v15  ;;  %v1403_v41 = vmin.f32 %v1371_v28, %v729_v22  ;;  %v742_v44 = vld [vmem:[#allocation3 + $0x1530] sm:$0xff]  ;;  %v895_v45 = vmin.f32 %v808_v35, %v809_v36  ;;  %v703_v47 = vld [vmem:[#allocation3 + $0x13f8] sm:$0xff]  ;;  %v1149_v48 = vmin.f32 %v1117_v33, %v769_v31  ;;  %v732_v57 = vld [vmem:[#allocation3 + $0x14e0] sm:$0xff] }
  0xf2   :  { %v1712_v38 = vpop.xlane.xlu0 %1711  ;;  %v1020_v49 = vmin.f32 %v988_v34, %v741_v32  ;;  %v811_v50 = vld [vmem:[#allocation3 + $0x1758] sm:$0xff]  ;;  %v1306_v53 = vmin.f32 %v1274_v42, %v702_v29  ;;  %v704_v58 = vld [vmem:[#allocation3 + $0x1400] sm:$0xff]  ;;  %v733_v63 = vld [vmem:[#allocation3 + $0x14e8] sm:$0xff] }
  0xf3   :  { %1770 = vst.msk [vmem:[%s1971_s1 + $0x30] sm:$0xff] %vm1763_vm0, %v1712_v38  ;;  %v1560_v51 = vmin.f32 %v1528_v40, %v662_v21  ;;  %v1435_v52 = vmin.f32 %v1403_v41, %v730_v23  ;;  %v771_v54 = vld [vmem:[#allocation3 + $0x1618] sm:$0xff]  ;;  %v927_v56 = vmin.f32 %v895_v45, %v810_v37  ;;  %v1181_v59 = vmin.f32 %v1149_v48, %v770_v43  ;;  %v812_v61 = vld [vmem:[#allocation3 + $0x1760] sm:$0xff]  ;;  %v734_v5 = vld [vmem:[#allocation3 + $0x14f0] sm:$0xff] }
  0xf4   :  { %v743_v55 = vld [vmem:[#allocation3 + $0x1538] sm:$0xff]  ;;  %v1052_v60 = vmin.f32 %v1020_v49, %v742_v44  ;;  %v1338_v1 = vmin.f32 %v1306_v53, %v703_v47  ;;  %v772_v2 = vld [vmem:[#allocation3 + $0x1620] sm:$0xff]  ;;  %v705_v6 = vld [vmem:[#allocation3 + $0x1408] sm:$0xff] }
  0xf5   :  { %v1592_v62 = vmin.f32 %v1560_v51, %v663_v39  ;;  %v1467_v0 = vmin.f32 %v1435_v52, %v731_v46  ;;  %v744_v3 = vld [vmem:[#allocation3 + $0x1540] sm:$0xff]  ;;  %v959_v4 = vmin.f32 %v927_v56, %v811_v50  ;;  %v706_v7 = vld [vmem:[#allocation3 + $0x1410] sm:$0xff]  ;;  %v1213_v8 = vmin.f32 %v1181_v59, %v771_v54  ;;  %v813_v10 = vld [vmem:[#allocation3 + $0x1768] sm:$0xff] }
  0xf6   :  { %v1084_v9 = vmin.f32 %v1052_v60, %v743_v55  ;;  %v1370_v12 = vmin.f32 %v1338_v1, %v704_v58  ;;  %v773_v13 = vld [vmem:[#allocation3 + $0x1628] sm:$0xff]  ;;  %v814_v15 = vld [vmem:[#allocation3 + $0x1770] sm:$0xff]  ;;  %v784_v19 = vld [vmem:[#allocation3 + $0x1680] sm:$0xff] }
  0xf7   :  { %1747 = vmin.xlane.f32.xlu0 %v1592_v62  ;;  %v1499_v11 = vmin.f32 %v1467_v0, %v732_v57  ;;  %v745_v14 = vld [vmem:[#allocation3 + $0x1548] sm:$0xff]  ;;  %v991_v16 = vmin.f32 %v959_v4, %v812_v61  ;;  %v1245_v17 = vmin.f32 %v1213_v8, %v772_v2  ;;  %v786_v21 = vld [vmem:[#allocation3 + $0x1690] sm:$0xff]  ;;  %v735_v23 = vld [vmem:[#allocation3 + $0x14f8] sm:$0xff] }
  0xf8   :  { %v1116_v18 = vmin.f32 %v1084_v9, %v744_v3  ;;  %v785_v20 = vld [vmem:[#allocation3 + $0x1688] sm:$0xff]  ;;  %v1718_v22 = vpop.xlane.xlu1 %1717  ;;  %v1402_v25 = vmin.f32 %v1370_v12, %v705_v6  ;;  %v774_v26 = vld [vmem:[#allocation3 + $0x1630] sm:$0xff]  ;;  %v707_v30 = vld [vmem:[#allocation3 + $0x1418] sm:$0xff] }
  0xf9   :  { %v1531_v24 = vmin.f32 %v1499_v11, %v733_v63  ;;  %v746_v27 = vld [vmem:[#allocation3 + $0x1550] sm:$0xff]  ;;  %v1023_v28 = vmin.f32 %v991_v16, %v813_v10  ;;  %v894_v29 = vmin.f32 %v784_v19, %v785_v20  ;;  %1773 = vst.msk [vmem:[%s1971_s1 + $0x48] sm:$0xff] %vm1763_vm0, %v1718_v22  ;;  %v1277_v31 = vmin.f32 %v1245_v17, %v773_v13  ;;  %v815_v33 = vld [vmem:[#allocation3 + $0x1778] sm:$0xff]  ;;  %v708_v41 = vld [vmem:[#allocation3 + $0x1420] sm:$0xff] }
  0xfa   :  { %v1148_v32 = vmin.f32 %v1116_v18, %v745_v14  ;;  %v787_v34 = vld [vmem:[#allocation3 + $0x1698] sm:$0xff]  ;;  %v1434_v36 = vmin.f32 %v1402_v25, %v706_v7  ;;  %v816_v44 = vld [vmem:[#allocation3 + $0x1780] sm:$0xff]  ;;  %v709_v52 = vld [vmem:[#allocation3 + $0x1428] sm:$0xff] }
  0xfb   :  { %v1563_v35 = vmin.f32 %v1531_v24, %v734_v5  ;;  %v775_v37 = vld [vmem:[#allocation3 + $0x1638] sm:$0xff]  ;;  %v1055_v39 = vmin.f32 %v1023_v28, %v814_v15  ;;  %v926_v40 = vmin.f32 %v894_v29, %v786_v21  ;;  %v1309_v42 = vmin.f32 %v1277_v31, %v774_v26  ;;  %v788_v45 = vld [vmem:[#allocation3 + $0x16a0] sm:$0xff]  ;;  %v817_v55 = vld [vmem:[#allocation3 + $0x1788] sm:$0xff] }
  0xfc   :  { %v747_v38 = vld [vmem:[#allocation3 + $0x1558] sm:$0xff]  ;;  %v1180_v43 = vmin.f32 %v1148_v32, %v746_v27  ;;  %v1466_v47 = vmin.f32 %v1434_v36, %v707_v30  ;;  %v776_v48 = vld [vmem:[#allocation3 + $0x1640] sm:$0xff]  ;;  %v789_v56 = vld [vmem:[#allocation3 + $0x16a8] sm:$0xff] }
  0xfd   :  { %v1595_v46 = vmin.f32 %v1563_v35, %v735_v23  ;;  %v748_v49 = vld [vmem:[#allocation3 + $0x1560] sm:$0xff]  ;;  %v1087_v50 = vmin.f32 %v1055_v39, %v815_v33  ;;  %v958_v51 = vmin.f32 %v926_v40, %v787_v34  ;;  %v1341_v53 = vmin.f32 %v1309_v42, %v775_v37  ;;  %v777_v58 = vld [vmem:[#allocation3 + $0x1648] sm:$0xff]  ;;  %v710_v62 = vld [vmem:[#allocation3 + $0x1430] sm:$0xff] }
  0xfe   :  { %v1212_v54 = vmin.f32 %v1180_v43, %v747_v38  ;;  %v1498_v57 = vmin.f32 %v1466_v47, %v708_v41  ;;  %v749_v59 = vld [vmem:[#allocation3 + $0x1568] sm:$0xff]  ;;  %v818_v1 = vld [vmem:[#allocation3 + $0x1790] sm:$0xff]  ;;  %v711_v9 = vld [vmem:[#allocation3 + $0x1438] sm:$0xff] }
  0xff   :  { %1753 = vmin.xlane.f32.xlu1 %v1595_v46  ;;  %v1119_v60 = vmin.f32 %v1087_v50, %v816_v44  ;;  %v990_v61 = vmin.f32 %v958_v51, %v788_v45  ;;  %v1373_v63 = vmin.f32 %v1341_v53, %v776_v48  ;;  %v790_v2 = vld [vmem:[#allocation3 + $0x16b0] sm:$0xff]  ;;  %v819_v12 = vld [vmem:[#allocation3 + $0x1798] sm:$0xff]  ;;  %v820_v21 = vld [vmem:[#allocation3 + $0x17a0] sm:$0xff] }
 0x100   :  { %v1244_v0 = vmin.f32 %v1212_v54, %v748_v49  ;;  %v1530_v4 = vmin.f32 %v1498_v57, %v709_v52  ;;  %v778_v5 = vld [vmem:[#allocation3 + $0x1650] sm:$0xff]  ;;  %v791_v13 = vld [vmem:[#allocation3 + $0x16b8] sm:$0xff]  ;;  %v792_v22 = vld [vmem:[#allocation3 + $0x16c0] sm:$0xff] }
 0x101   :  { %v1716_v3 = vpop.xlane.xlu0 %1715  ;;  %v750_v6 = vld [vmem:[#allocation3 + $0x1570] sm:$0xff]  ;;  %v1151_v7 = vmin.f32 %v1119_v60, %v817_v55  ;;  %v1022_v8 = vmin.f32 %v990_v61, %v789_v56  ;;  %v1405_v10 = vmin.f32 %v1373_v63, %v777_v58  ;;  %v779_v15 = vld [vmem:[#allocation3 + $0x1658] sm:$0xff]  ;;  %v780_v24 = vld [vmem:[#allocation3 + $0x1660] sm:$0xff] }
 0x102   :  { %1772 = vst.msk [vmem:[%s1971_s1 + $0x40] sm:$0xff] %vm1763_vm0, %v1716_v3  ;;  %v1276_v11 = vmin.f32 %v1244_v0, %v749_v59  ;;  %v1562_v14 = vmin.f32 %v1530_v4, %v710_v62  ;;  %v751_v16 = vld [vmem:[#allocation3 + $0x1578] sm:$0xff]  ;;  %v752_v25 = vld [vmem:[#allocation3 + $0x1580] sm:$0xff]  ;;  %v821_v30 = vld [vmem:[#allocation3 + $0x17a8] sm:$0xff] }
 0x103   :  { %v1183_v17 = vmin.f32 %v1151_v7, %v818_v1  ;;  %v1054_v18 = vmin.f32 %v1022_v8, %v790_v2  ;;  %v1437_v19 = vmin.f32 %v1405_v10, %v778_v5  ;;  %v793_v31 = vld [vmem:[#allocation3 + $0x16c8] sm:$0xff]  ;;  %v822_v38 = vld [vmem:[#allocation3 + $0x17b0] sm:$0xff]  ;;  %v823_v47 = vld [vmem:[#allocation3 + $0x17b8] sm:$0xff] }
 0x104   :  { %v1308_v20 = vmin.f32 %v1276_v11, %v750_v6  ;;  %v1594_v23 = vmin.f32 %v1562_v14, %v711_v9  ;;  %v781_v32 = vld [vmem:[#allocation3 + $0x1668] sm:$0xff]  ;;  %v794_v39 = vld [vmem:[#allocation3 + $0x16d0] sm:$0xff]  ;;  %v795_v48 = vld [vmem:[#allocation3 + $0x16d8] sm:$0xff] }
 0x105   :  { %v1215_v26 = vmin.f32 %v1183_v17, %v819_v12  ;;  %v1086_v27 = vmin.f32 %v1054_v18, %v791_v13  ;;  %v1469_v28 = vmin.f32 %v1437_v19, %v779_v15  ;;  %v753_v33 = vld [vmem:[#allocation3 + $0x1588] sm:$0xff]  ;;  %v782_v40 = vld [vmem:[#allocation3 + $0x1670] sm:$0xff]  ;;  %v783_v49 = vld [vmem:[#allocation3 + $0x1678] sm:$0xff] }
 0x106   :  { %v1340_v29 = vmin.f32 %v1308_v20, %v751_v16  ;;  %1751 = vmin.xlane.f32.xlu0 %v1594_v23  ;;  %v754_v41 = vld [vmem:[#allocation3 + $0x1590] sm:$0xff]  ;;  %v755_v50 = vld [vmem:[#allocation3 + $0x1598] sm:$0xff]  ;;  %v824_v55 = vld [vmem:[#allocation3 + $0x17c0] sm:$0xff] }
 0x107   :  { %v1247_v34 = vmin.f32 %v1215_v26, %v820_v21  ;;  %v1118_v35 = vmin.f32 %v1086_v27, %v792_v22  ;;  %v1501_v36 = vmin.f32 %v1469_v28, %v780_v24  ;;  %v796_v56 = vld [vmem:[#allocation3 + $0x16e0] sm:$0xff]  ;;  %v825_v62 = vld [vmem:[#allocation3 + $0x17c8] sm:$0xff]  ;;  %v826_v4 = vld [vmem:[#allocation3 + $0x17d0] sm:$0xff] }
 0x108   :  { %v1372_v37 = vmin.f32 %v1340_v29, %v752_v25  ;;  %v1722_v44 = vpop.xlane.xlu1 %1721  ;;  %v756_v57 = vld [vmem:[#allocation3 + $0x15a0] sm:$0xff]  ;;  %v797_v63 = vld [vmem:[#allocation3 + $0x16e8] sm:$0xff]  ;;  %v798_v5 = vld [vmem:[#allocation3 + $0x16f0] sm:$0xff] }
 0x109   :  { %v1279_v42 = vmin.f32 %v1247_v34, %v821_v30  ;;  %v1150_v43 = vmin.f32 %v1118_v35, %v793_v31  ;;  %v1533_v45 = vmin.f32 %v1501_v36, %v781_v32  ;;  %1775 = vst.msk [vmem:[%s1971_s1 + $0x58] sm:$0xff] %vm1763_vm0, %v1722_v44  ;;  %v757_v0 = vld [vmem:[#allocation3 + $0x15a8] sm:$0xff]  ;;  %v758_v6 = vld [vmem:[#allocation3 + $0x15b0] sm:$0xff]  ;;  %v827_v11 = vld [vmem:[#allocation3 + $0x17d8] sm:$0xff] }
 0x10a   :  { %v1404_v46 = vmin.f32 %v1372_v37, %v753_v33  ;;  %v799_v12 = vld [vmem:[#allocation3 + $0x16f8] sm:$0xff]  ;;  %v828_v17 = vld [vmem:[#allocation3 + $0x17e0] sm:$0xff]  ;;  %v829_v22 = vld [vmem:[#allocation3 + $0x17e8] sm:$0xff] }
 0x10b   :  { %v1311_v51 = vmin.f32 %v1279_v42, %v822_v38  ;;  %v1182_v52 = vmin.f32 %v1150_v43, %v794_v39  ;;  %v1565_v53 = vmin.f32 %v1533_v45, %v782_v40  ;;  %v759_v13 = vld [vmem:[#allocation3 + $0x15b8] sm:$0xff]  ;;  %v800_v18 = vld [vmem:[#allocation3 + $0x1700] sm:$0xff]  ;;  %v801_v23 = vld [vmem:[#allocation3 + $0x1708] sm:$0xff] }
 0x10c   :  { %v1436_v54 = vmin.f32 %v1404_v46, %v754_v41  ;;  %v830_v26 = vld [vmem:[#allocation3 + $0x17f0] sm:$0xff]  ;;  %v831_v31 = vld [vmem:[#allocation3 + $0x17f8] sm:$0xff]  ;;  %v804_v35 = vld [vmem:[#allocation3 + $0x1720] sm:$0xff] }
 0x10d   :  { %v1343_v58 = vmin.f32 %v1311_v51, %v823_v47  ;;  %v1214_v59 = vmin.f32 %v1182_v52, %v795_v48  ;;  %v1597_v60 = vmin.f32 %v1565_v53, %v783_v49  ;;  %v802_v27 = vld [vmem:[#allocation3 + $0x1710] sm:$0xff]  ;;  %v803_v32 = vld [vmem:[#allocation3 + $0x1718] sm:$0xff]  ;;  %v805_v38 = vld [vmem:[#allocation3 + $0x1728] sm:$0xff] }
 0x10e   :  { %v1468_v61 = vmin.f32 %v1436_v54, %v755_v50  ;;  %v806_v40 = vld [vmem:[#allocation3 + $0x1730] sm:$0xff]  ;;  %v807_v43 = vld [vmem:[#allocation3 + $0x1738] sm:$0xff] }
 0x10f   :  { %v1375_v1 = vmin.f32 %v1343_v58, %v824_v55  ;;  %v1246_v2 = vmin.f32 %v1214_v59, %v796_v56  ;;  %1757 = vmin.xlane.f32.xlu1 %v1597_v60 }
 0x110   :  { %v1500_v3 = vmin.f32 %v1468_v61, %v756_v57  ;;  %v1720_v9 = vpop.xlane.xlu0 %1719 }
 0x111   :  { %v1407_v7 = vmin.f32 %v1375_v1, %v825_v62  ;;  %v1278_v8 = vmin.f32 %v1246_v2, %v797_v63  ;;  %1774 = vst.msk [vmem:[%s1971_s1 + $0x50] sm:$0xff] %vm1763_vm0, %v1720_v9 }
 0x112   :  { %v1532_v10 = vmin.f32 %v1500_v3, %v757_v0 }
 0x113   :  { %v1439_v14 = vmin.f32 %v1407_v7, %v826_v4  ;;  %v1310_v15 = vmin.f32 %v1278_v8, %v798_v5 }
 0x114   :  { %v1564_v16 = vmin.f32 %v1532_v10, %v758_v6 }
 0x115   :  { %v1471_v19 = vmin.f32 %v1439_v14, %v827_v11  ;;  %v1342_v20 = vmin.f32 %v1310_v15, %v799_v12 }
 0x116   :  { %v1596_v21 = vmin.f32 %v1564_v16, %v759_v13 }
 0x117   :  { %v1503_v24 = vmin.f32 %v1471_v19, %v828_v17  ;;  %v1374_v25 = vmin.f32 %v1342_v20, %v800_v18 }
 0x118   :  { %1755 = vmin.xlane.f32.xlu0 %v1596_v21 }
 0x119   :  { %v1726_v28 = vpop.xlane.xlu1 %1725  ;;  %v1535_v29 = vmin.f32 %v1503_v24, %v829_v22  ;;  %v1406_v30 = vmin.f32 %v1374_v25, %v801_v23 }
 0x11a   :  { %1777 = vst.msk [vmem:[%s1971_s1 + $0x68] sm:$0xff] %vm1763_vm0, %v1726_v28 }
 0x11b   :  { %v1567_v33 = vmin.f32 %v1535_v29, %v830_v26  ;;  %v1438_v34 = vmin.f32 %v1406_v30, %v802_v27 }
 0x11d   :  { %v1599_v36 = vmin.f32 %v1567_v33, %v831_v31  ;;  %v1470_v37 = vmin.f32 %v1438_v34, %v803_v32 }
 0x11f   :  { %1761 = vmin.xlane.f32.xlu1 %v1599_v36  ;;  %v1502_v39 = vmin.f32 %v1470_v37, %v804_v35 }
 0x120   :  { %v1724_v41 = vpop.xlane.xlu0 %1723 }
 0x121   :  { %v1534_v42 = vmin.f32 %v1502_v39, %v805_v38  ;;  %1776 = vst.msk [vmem:[%s1971_s1 + $0x60] sm:$0xff] %vm1763_vm0, %v1724_v41 }
 0x123   :  { %v1566_v44 = vmin.f32 %v1534_v42, %v806_v40 }
 0x125   :  { %v1598_v45 = vmin.f32 %v1566_v44, %v807_v43 }
 0x127   :  { %1759 = vmin.xlane.f32.xlu0 %v1598_v45 }
 0x128   :  { %v1730_v46 = vpop.xlane.xlu1 %1729 }
 0x129   :  { %1779 = vst.msk [vmem:[%s1971_s1 + $0x78] sm:$0xff] %vm1763_vm0, %v1730_v46 }
 0x12f   :  { %v1728_v47 = vpop.xlane.xlu0 %1727 }
 0x130   :  { %1778 = vst.msk [vmem:[%s1971_s1 + $0x70] sm:$0xff] %vm1763_vm0, %v1728_v47 }
 0x138   :  { %v1734_v48 = vpop.xlane.xlu1 %1733 }
 0x139   :  { %1781 = vst.msk [vmem:[%s1971_s1 + $0x88] sm:$0xff] %vm1763_vm0, %v1734_v48 }
 0x141   :  { %v1732_v49 = vpop.xlane.xlu0 %1731 }
 0x142   :  { %1780 = vst.msk [vmem:[%s1971_s1 + $0x80] sm:$0xff] %vm1763_vm0, %v1732_v49 }
 0x148   :  { %v1738_v50 = vpop.xlane.xlu1 %1737 }
 0x149   :  { %1783 = vst.msk [vmem:[%s1971_s1 + $0x98] sm:$0xff] %vm1763_vm0, %v1738_v50 }
 0x150   :  { %v1736_v51 = vpop.xlane.xlu0 %1735 }
 0x151   :  { %1782 = vst.msk [vmem:[%s1971_s1 + $0x90] sm:$0xff] %vm1763_vm0, %v1736_v51 }
 0x158   :  { %v1742_v52 = vpop.xlane.xlu1 %1741 }
 0x159   :  { %1785 = vst.msk [vmem:[%s1971_s1 + $0xa8] sm:$0xff] %vm1763_vm0, %v1742_v52 }
 0x15f   :  { %v1740_v53 = vpop.xlane.xlu0 %1739 }
 0x160   :  { %1784 = vst.msk [vmem:[%s1971_s1 + $0xa0] sm:$0xff] %vm1763_vm0, %v1740_v53 }
 0x16a   :  { %v1746_v54 = vpop.xlane.xlu1 %1745 }
 0x16b   :  { %1787 = vst.msk [vmem:[%s1971_s1 + $0xb8] sm:$0xff] %vm1763_vm0, %v1746_v54 }
 0x171   :  { %v1744_v55 = vpop.xlane.xlu0 %1743 }
 0x172   :  { %1786 = vst.msk [vmem:[%s1971_s1 + $0xb0] sm:$0xff] %vm1763_vm0, %v1744_v55 }
 0x178   :  { %v1750_v56 = vpop.xlane.xlu1 %1749 }
 0x179   :  { %1789 = vst.msk [vmem:[%s1971_s1 + $0xc8] sm:$0xff] %vm1763_vm0, %v1750_v56 }
 0x180   :  { %v1748_v57 = vpop.xlane.xlu0 %1747 }
 0x181   :  { %1788 = vst.msk [vmem:[%s1971_s1 + $0xc0] sm:$0xff] %vm1763_vm0, %v1748_v57 }
 0x188   :  { %v1754_v58 = vpop.xlane.xlu1 %1753 }
 0x189   :  { %1791 = vst.msk [vmem:[%s1971_s1 + $0xd8] sm:$0xff] %vm1763_vm0, %v1754_v58 }
 0x18f   :  { %v1752_v59 = vpop.xlane.xlu0 %1751 }
 0x190   :  { %1790 = vst.msk [vmem:[%s1971_s1 + $0xd0] sm:$0xff] %vm1763_vm0, %v1752_v59 }
 0x198   :  { %v1758_v60 = vpop.xlane.xlu1 %1757 }
 0x199   :  { %1793 = vst.msk [vmem:[%s1971_s1 + $0xe8] sm:$0xff] %vm1763_vm0, %v1758_v60 }
 0x1a1   :  { %v1756_v61 = vpop.xlane.xlu0 %1755 }
 0x1a2   :  { %1792 = vst.msk [vmem:[%s1971_s1 + $0xe0] sm:$0xff] %vm1763_vm0, %v1756_v61 }
 0x1a8   :  { %v1762_v62 = vpop.xlane.xlu1 %1761 }
 0x1a9   :  { %1795 = vst.msk [vmem:[%s1971_s1 + $0xf8] sm:$0xff] %vm1763_vm0, %v1762_v62 }
 0x1b0   :  { %v1760_v63 = vpop.xlane.xlu0 %1759 }
 0x1b1   :  { %1794 = vst.msk [vmem:[%s1971_s1 + $0xf0] sm:$0xff] %vm1763_vm0, %v1760_v63 }
 0x1b2   :  { %1800 = vsyncpa [#allocation4], 1 }

</bundles_post_ra>
